<compile_context>
chip_gen: v5e
topology: v5e:2x2
jax: 0.10.0
libtpu: 0.0.40
codegen_flags: <defaults>
</compile_context>

<pallas_src>
import jax
import jax.numpy as jnp
from jax.experimental import pallas as pl
from jax.experimental.pallas import tpu as pltpu

EPS = 1e-5          # torch.nn.LayerNorm default eps
_ROW_GRAN = 16      # row granule safe for both f32 and bf16 blocks


def _round_up(x, m):
    return ((x + m - 1) // m) * m


def _num_tensorcores():
    """2 TensorCores per chip on v7x, 1 on v5e/v6e."""
    try:
        kind = jax.devices()[0].device_kind.lower()
    except Exception:
        return 1
    return 2 if "v7" in kind else 1


def _pick_tile(B, tile_b, num_cores):
    """Batch-tile selection.

    Multiple of 16, clamped to the padded batch.  Only split the batch into
    multiple grid steps when (a) the chip has >1 TensorCore (v7x) AND (b) each
    half is still an MXU-friendly M (>= 128 rows).  On single-TC chips the
    grid is a sequential loop, so splitting a batch that fits one tile only
    adds per-step overhead.
    """
    Bg = _round_up(B, _ROW_GRAN)
    t = max(_ROW_GRAN, min(tile_b, Bg))
    t = (t // _ROW_GRAN) * _ROW_GRAN
    if num_cores > 1 and t >= Bg:
        half = _round_up(pl.cdiv(Bg, num_cores), _ROW_GRAN)
        if half >= 128:
            t = half
    return t


def _layernorm(h, gamma, beta):
    # Two-pass formulation (matches torch; avoids E[x^2]-E[x]^2 cancellation).
    mu = jnp.mean(h, axis=-1, keepdims=True)
    c = h - mu
    var = jnp.mean(c * c, axis=-1, keepdims=True)
    return c * jax.lax.rsqrt(var + EPS) * gamma + beta


def actor_kernel(x_ref,
                 w1_ref, b1_ref, g1_ref, be1_ref,
                 w2_ref, b2_ref, g2_ref, be2_ref,
                 w3_ref, b3_ref,
                 out_ref):
    x = x_ref[...]

    # fc1 + LayerNorm + ReLU.  MXU operands follow the weight dtype (bf16 by
    # default, f32 in the precise path); accumulation is always f32.
    h1 = jnp.dot(x.astype(w1_ref.dtype), w1_ref[...],
                 preferred_element_type=jnp.float32) + b1_ref[...]
    h1 = jnp.maximum(_layernorm(h1, g1_ref[...], be1_ref[...]), 0.0)

    # fc2 + LayerNorm + ReLU
    h2 = jnp.dot(h1.astype(w2_ref.dtype), w2_ref[...],
                 preferred_element_type=jnp.float32) + b2_ref[...]
    h2 = jnp.maximum(_layernorm(h2, g2_ref[...], be2_ref[...]), 0.0)

    # Output head (lane-dense, padded to 128 columns) + softmax(dim=-1).
    # Padded columns carry a -1e30 bias, so exp() gives them exactly 0 weight.
    logits = jnp.dot(h2.astype(w3_ref.dtype), w3_ref[...],
                     preferred_element_type=jnp.float32) + b3_ref[...]
    m = jnp.max(logits, axis=-1, keepdims=True)
    e = jnp.exp(logits - m)
    # Exact normalization (approx reciprocal left probs only ~1e-3 normalized).
    probs = e / jnp.sum(e, axis=-1, keepdims=True)
    out_ref[...] = probs.astype(out_ref.dtype)


def actor_forward(state, params, *, tile_b=1024, precise=False,
                  out_dtype=jnp.float32):
    """state: (B, input_dims) f32.  Returns Categorical probs (B, n_actions)."""
    (w1, b1, g1, be1, w2, b2, g2, be2, w3, b3) = params
    B, d_in = state.shape
    f1 = w1.shape[1]
    f2 = w2.shape[1]
    n_actions = w3.shape[1]

    # ---- wrapper-side layout plumbing (no extra kernel compute) ------------
    # Lane-dense output: pad the action head to a multiple of 128 columns.
    n_pad = _round_up(n_actions, 128)
    w3p = jnp.zeros((f2, n_pad), w3.dtype).at[:, :n_actions].set(w3)
    b3p = jnp.full((n_pad,), -1e30, jnp.float32).at[:n_actions].set(b3)

    # Batch tiling / padding.
    tile = _pick_tile(B, tile_b, _num_tensorcores())
    B_pad = _round_up(B, tile)
    x = state if B_pad == B else jnp.pad(state, ((0, B_pad - B), (0, 0)))

    if precise:
        w1c, w2c, w3c = w1, w2, w3p
    else:
        # bf16 MXU operands + bf16 input streaming (f32 accumulation in-kernel).
        w1c, w2c, w3c = (w.astype(jnp.bfloat16) for w in (w1, w2, w3p))
        x = x.astype(jnp.bfloat16)

    row = lambda v: v.reshape(1, -1).astype(jnp.float32)
    b1r, g1r, be1r = row(b1), row(g1), row(be1)
    b2r, g2r, be2r = row(b2), row(g2), row(be2)
    b3r = row(b3p)

    operands = (x, w1c, b1r, g1r, be1r, w2c, b2r, g2r, be2r, w3c, b3r)

    # Cost estimate (helps XLA overlap this small call).
    out_itemsize = jnp.dtype(out_dtype).itemsize
    flops = 2 * B_pad * (d_in * f1 + f1 * f2 + f2 * n_pad)
    transcendentals = B_pad * (n_pad + 2)  # exp per logit + rsqrt per LN row
    bytes_accessed = (sum(int(a.size) * jnp.dtype(a.dtype).itemsize
                          for a in operands)
                      + B_pad * n_pad * out_itemsize)

    # Explicit VMEM budget (double-buffered I/O blocks + resident params +
    # f32 temporaries), so large batch tiles don't trip the scoped default.
    io_bytes = 2 * tile * (d_in * jnp.dtype(x.dtype).itemsize
                           + n_pad * out_itemsize)
    param_bytes = 2 * sum(int(a.size) * jnp.dtype(a.dtype).itemsize
                          for a in operands[1:])
    tmp_bytes = 4 * tile * max(f1, f2) * 4
    vmem_estimate = io_bytes + param_bytes + tmp_bytes + (2 << 20)
    vmem_limit = None if vmem_estimate <= (24 << 20) else min(vmem_estimate,
                                                              64 << 20)

    grid = (B_pad // tile,)
    # Parameter blocks are constant-index (same block every grid step); Pallas
    # keeps them resident and does not re-DMA per step at these sizes.
    param_spec = lambda shp: pl.BlockSpec(shp, lambda i: (0, 0))

    out = pl.pallas_call(
        actor_kernel,
        out_shape=jax.ShapeDtypeStruct((B_pad, n_pad), out_dtype),
        grid_spec=pltpu.PrefetchScalarGridSpec(
            num_scalar_prefetch=0,
            grid=grid,
            in_specs=[
                pl.BlockSpec((tile, d_in), lambda i: (i, 0)),      # state tile
                param_spec((d_in, f1)), param_spec((1, f1)),       # w1, b1
                param_spec((1, f1)), param_spec((1, f1)),          # ln1 g, b
                param_spec((f1, f2)), param_spec((1, f2)),         # w2, b2
                param_spec((1, f2)), param_spec((1, f2)),          # ln2 g, b
                param_spec((f2, n_pad)), param_spec((1, n_pad)),   # w3, b3
            ],
            out_specs=pl.BlockSpec((tile, n_pad), lambda i: (i, 0)),
        ),
        compiler_params=pltpu.CompilerParams(
            dimension_semantics=("parallel",),
            vmem_limit_bytes=vmem_limit),
        cost_estimate=pl.CostEstimate(flops=flops,
                                      transcendentals=transcendentals,
                                      bytes_accessed=bytes_accessed),
    )(*operands)

    # For tiny per-RL-step batches, keeping the padded (B_pad, 128) buffer and
    # slicing lazily downstream avoids the lane-sparse copy here.
    return out[:B, :n_actions]


def init_params(key, d_in, f1, f2, n_actions):
    """nn.Linear default init (uniform +/- 1/sqrt(fan_in)), LayerNorm defaults
    (gamma=1, beta=0). Weights stored as (in, out)."""
    ks = jax.random.split(key, 6)

    def lin(kw, kb, fan_in, fan_out):
        bound = 1.0 / jnp.sqrt(fan_in)
        w = jax.random.uniform(kw, (fan_in, fan_out), jnp.float32, -bound, bound)
        b = jax.random.uniform(kb, (fan_out,), jnp.float32, -bound, bound)
        return w, b

    w1, b1 = lin(ks[0], ks[1], d_in, f1)
    w2, b2 = lin(ks[2], ks[3], f1, f2)
    w3, b3 = lin(ks[4], ks[5], f2, n_actions)
    g1, be1 = jnp.ones((f1,), jnp.float32), jnp.zeros((f1,), jnp.float32)
    g2, be2 = jnp.ones((f2,), jnp.float32), jnp.zeros((f2,), jnp.float32)
    return (w1, b1, g1, be1, w2, b2, g2, be2, w3, b3)


def _reference(state, params):
    (w1, b1, g1, be1, w2, b2, g2, be2, w3, b3) = params

    def ln(h, g, b):
        mu = jnp.mean(h, axis=-1, keepdims=True)
        var = jnp.mean((h - mu) ** 2, axis=-1, keepdims=True)
        return (h - mu) / jnp.sqrt(var + EPS) * g + b

    h = jnp.maximum(ln(state @ w1 + b1, g1, be1), 0.0)
    h = jnp.maximum(ln(h @ w2 + b2, g2, be2), 0.0)
    return jax.nn.softmax(h @ w3 + b3, axis=-1)


if __name__ == "__main__":
    # Small shapes consistent with the module: batch=40 (exercises batch
    # padding), input_dims=(32,), fc1_dims=fc2_dims=256, n_actions=16.
    B, D_IN, F1, F2, N_ACTIONS = 40, 32, 256, 256, 16

    key = jax.random.PRNGKey(0)
    k_state, k_params = jax.random.split(key)
    state = jax.random.normal(k_state, (B, D_IN), dtype=jnp.float32)
    params = init_params(k_params, D_IN, F1, F2, N_ACTIONS)

    ref = _reference(state, params)

    # Default path (bf16 MXU operands, exact softmax normalization).
    probs = jax.block_until_ready(actor_forward(state, params))
    assert probs.shape == (B, N_ACTIONS)
    assert jnp.allclose(jnp.sum(probs, axis=-1), 1.0, atol=1e-5)
    assert jnp.allclose(probs, ref, atol=2e-2, rtol=2e-2)

    # Precise path (f32 MXU operands): tighter check.
    probs_precise = jax.block_until_ready(
        actor_forward(state, params, precise=True))
    assert probs_precise.shape == (B, N_ACTIONS)
    assert jnp.allclose(jnp.sum(probs_precise, axis=-1), 1.0, atol=1e-5)
    assert jnp.allclose(probs_precise, ref, atol=1e-4, rtol=1e-3)

    print("KERNEL_OK")
</pallas_src>

<mosaic_0001>
module attributes {stable_mosaic.version = 11 : i64} {
  func.func @actor_kernel(%arg0: i32, %arg1: memref<48x32xbf16, #tpu.memory_space<vmem>>, %arg2: memref<32x256xbf16, #tpu.memory_space<vmem>>, %arg3: memref<1x256xf32, #tpu.memory_space<vmem>>, %arg4: memref<1x256xf32, #tpu.memory_space<vmem>>, %arg5: memref<1x256xf32, #tpu.memory_space<vmem>>, %arg6: memref<256x256xbf16, #tpu.memory_space<vmem>>, %arg7: memref<1x256xf32, #tpu.memory_space<vmem>>, %arg8: memref<1x256xf32, #tpu.memory_space<vmem>>, %arg9: memref<1x256xf32, #tpu.memory_space<vmem>>, %arg10: memref<256x128xbf16, #tpu.memory_space<vmem>>, %arg11: memref<1x128xf32, #tpu.memory_space<vmem>>, %arg12: memref<48x128xf32, #tpu.memory_space<vmem>>) attributes {dimension_semantics = [#tpu.dimension_semantics<parallel>], iteration_bounds = array<i64: 1>, scalar_prefetch = 0 : i64, scratch_operands = 0 : i64, tpu.core_type = #tpu.core_type<tc>, window_params = [{transform_indices = @transform_0, window_bounds = array<i64: 48, 32>}, {pipeline_mode = #tpu.pipeline_mode<synchronous>, transform_indices = @transform_1, window_bounds = array<i64: 32, 256>}, {pipeline_mode = #tpu.pipeline_mode<synchronous>, transform_indices = @transform_2, window_bounds = array<i64: 1, 256>}, {pipeline_mode = #tpu.pipeline_mode<synchronous>, transform_indices = @transform_3, window_bounds = array<i64: 1, 256>}, {pipeline_mode = #tpu.pipeline_mode<synchronous>, transform_indices = @transform_4, window_bounds = array<i64: 1, 256>}, {pipeline_mode = #tpu.pipeline_mode<synchronous>, transform_indices = @transform_5, window_bounds = array<i64: 256, 256>}, {pipeline_mode = #tpu.pipeline_mode<synchronous>, transform_indices = @transform_6, window_bounds = array<i64: 1, 256>}, {pipeline_mode = #tpu.pipeline_mode<synchronous>, transform_indices = @transform_7, window_bounds = array<i64: 1, 256>}, {pipeline_mode = #tpu.pipeline_mode<synchronous>, transform_indices = @transform_8, window_bounds = array<i64: 1, 256>}, {pipeline_mode = #tpu.pipeline_mode<synchronous>, transform_indices = @transform_9, window_bounds = array<i64: 256, 128>}, {pipeline_mode = #tpu.pipeline_mode<synchronous>, transform_indices = @transform_10, window_bounds = array<i64: 1, 128>}, {transform_indices = @transform_11, window_bounds = array<i64: 48, 128>}]} {
    %c0 = arith.constant 0 : index
    %c0_0 = arith.constant 0 : index
    %0 = vector.load %arg1[%c0, %c0_0] : memref<48x32xbf16, #tpu.memory_space<vmem>>, vector<48x32xbf16>
    %c0_1 = arith.constant 0 : index
    %c0_2 = arith.constant 0 : index
    %1 = vector.load %arg2[%c0_1, %c0_2] : memref<32x256xbf16, #tpu.memory_space<vmem>>, vector<32x256xbf16>
    %cst = arith.constant dense<0.000000e+00> : vector<48x256xf32>
    %2 = tpu.matmul %0, %1, %cst {dimension_numbers = #tpu.dot_dimension_numbers<[1], [0], [0], [1], [0, 0, 1, 1], [], []>} : vector<48x32xbf16>, vector<32x256xbf16>, vector<48x256xf32> -> vector<48x256xf32>
    %c0_3 = arith.constant 0 : index
    %c0_4 = arith.constant 0 : index
    %3 = vector.load %arg3[%c0_3, %c0_4] : memref<1x256xf32, #tpu.memory_space<vmem>>, vector<1x256xf32>
    %4 = vector.broadcast %3 : vector<1x256xf32> to vector<48x256xf32>
    %5 = arith.addf %2, %4 : vector<48x256xf32>
    %c0_5 = arith.constant 0 : index
    %c0_6 = arith.constant 0 : index
    %6 = vector.load %arg4[%c0_5, %c0_6] : memref<1x256xf32, #tpu.memory_space<vmem>>, vector<1x256xf32>
    %c0_7 = arith.constant 0 : index
    %c0_8 = arith.constant 0 : index
    %7 = vector.load %arg5[%c0_7, %c0_8] : memref<1x256xf32, #tpu.memory_space<vmem>>, vector<1x256xf32>
    %cst_9 = arith.constant dense<0.000000e+00> : vector<48xf32>
    %8 = vector.multi_reduction <add>, %5, %cst_9 [1] : vector<48x256xf32> to vector<48xf32>
    %9 = vector.shape_cast %8 : vector<48xf32> to vector<48x1xf32>
    %cst_10 = arith.constant 2.560000e+02 : f32
    %10 = vector.broadcast %cst_10 : f32 to vector<48x1xf32>
    %11 = arith.divf %9, %10 : vector<48x1xf32>
    %12 = vector.broadcast %11 : vector<48x1xf32> to vector<48x256xf32>
    %13 = arith.subf %5, %12 : vector<48x256xf32>
    %14 = arith.mulf %13, %13 : vector<48x256xf32>
    %cst_11 = arith.constant dense<0.000000e+00> : vector<48xf32>
    %15 = vector.multi_reduction <add>, %14, %cst_11 [1] : vector<48x256xf32> to vector<48xf32>
    %16 = vector.shape_cast %15 : vector<48xf32> to vector<48x1xf32>
    %cst_12 = arith.constant 2.560000e+02 : f32
    %17 = vector.broadcast %cst_12 : f32 to vector<48x1xf32>
    %18 = arith.divf %16, %17 : vector<48x1xf32>
    %cst_13 = arith.constant 9.99999974E-6 : f32
    %19 = vector.broadcast %cst_13 : f32 to vector<48x1xf32>
    %20 = arith.addf %18, %19 : vector<48x1xf32>
    %21 = math.rsqrt %20 : vector<48x1xf32>
    %22 = vector.broadcast %21 : vector<48x1xf32> to vector<48x256xf32>
    %23 = arith.mulf %13, %22 : vector<48x256xf32>
    %24 = vector.broadcast %6 : vector<1x256xf32> to vector<48x256xf32>
    %25 = arith.mulf %23, %24 : vector<48x256xf32>
    %26 = vector.broadcast %7 : vector<1x256xf32> to vector<48x256xf32>
    %27 = arith.addf %25, %26 : vector<48x256xf32>
    %cst_14 = arith.constant 0.000000e+00 : f32
    %28 = vector.broadcast %cst_14 : f32 to vector<48x256xf32>
    %29 = arith.maximumf %27, %28 : vector<48x256xf32>
    %30 = arith.truncf %29 : vector<48x256xf32> to vector<48x256xbf16>
    %c0_15 = arith.constant 0 : index
    %c0_16 = arith.constant 0 : index
    %31 = vector.load %arg6[%c0_15, %c0_16] : memref<256x256xbf16, #tpu.memory_space<vmem>>, vector<256x256xbf16>
    %cst_17 = arith.constant dense<0.000000e+00> : vector<48x256xf32>
    %32 = tpu.matmul %30, %31, %cst_17 {dimension_numbers = #tpu.dot_dimension_numbers<[1], [0], [0], [1], [0, 0, 1, 1], [], []>} : vector<48x256xbf16>, vector<256x256xbf16>, vector<48x256xf32> -> vector<48x256xf32>
    %c0_18 = arith.constant 0 : index
    %c0_19 = arith.constant 0 : index
    %33 = vector.load %arg7[%c0_18, %c0_19] : memref<1x256xf32, #tpu.memory_space<vmem>>, vector<1x256xf32>
    %34 = vector.broadcast %33 : vector<1x256xf32> to vector<48x256xf32>
    %35 = arith.addf %32, %34 : vector<48x256xf32>
    %c0_20 = arith.constant 0 : index
    %c0_21 = arith.constant 0 : index
    %36 = vector.load %arg8[%c0_20, %c0_21] : memref<1x256xf32, #tpu.memory_space<vmem>>, vector<1x256xf32>
    %c0_22 = arith.constant 0 : index
    %c0_23 = arith.constant 0 : index
    %37 = vector.load %arg9[%c0_22, %c0_23] : memref<1x256xf32, #tpu.memory_space<vmem>>, vector<1x256xf32>
    %cst_24 = arith.constant dense<0.000000e+00> : vector<48xf32>
    %38 = vector.multi_reduction <add>, %35, %cst_24 [1] : vector<48x256xf32> to vector<48xf32>
    %39 = vector.shape_cast %38 : vector<48xf32> to vector<48x1xf32>
    %cst_25 = arith.constant 2.560000e+02 : f32
    %40 = vector.broadcast %cst_25 : f32 to vector<48x1xf32>
    %41 = arith.divf %39, %40 : vector<48x1xf32>
    %42 = vector.broadcast %41 : vector<48x1xf32> to vector<48x256xf32>
    %43 = arith.subf %35, %42 : vector<48x256xf32>
    %44 = arith.mulf %43, %43 : vector<48x256xf32>
    %cst_26 = arith.constant dense<0.000000e+00> : vector<48xf32>
    %45 = vector.multi_reduction <add>, %44, %cst_26 [1] : vector<48x256xf32> to vector<48xf32>
    %46 = vector.shape_cast %45 : vector<48xf32> to vector<48x1xf32>
    %cst_27 = arith.constant 2.560000e+02 : f32
    %47 = vector.broadcast %cst_27 : f32 to vector<48x1xf32>
    %48 = arith.divf %46, %47 : vector<48x1xf32>
    %cst_28 = arith.constant 9.99999974E-6 : f32
    %49 = vector.broadcast %cst_28 : f32 to vector<48x1xf32>
    %50 = arith.addf %48, %49 : vector<48x1xf32>
    %51 = math.rsqrt %50 : vector<48x1xf32>
    %52 = vector.broadcast %51 : vector<48x1xf32> to vector<48x256xf32>
    %53 = arith.mulf %43, %52 : vector<48x256xf32>
    %54 = vector.broadcast %36 : vector<1x256xf32> to vector<48x256xf32>
    %55 = arith.mulf %53, %54 : vector<48x256xf32>
    %56 = vector.broadcast %37 : vector<1x256xf32> to vector<48x256xf32>
    %57 = arith.addf %55, %56 : vector<48x256xf32>
    %cst_29 = arith.constant 0.000000e+00 : f32
    %58 = vector.broadcast %cst_29 : f32 to vector<48x256xf32>
    %59 = arith.maximumf %57, %58 : vector<48x256xf32>
    %60 = arith.truncf %59 : vector<48x256xf32> to vector<48x256xbf16>
    %c0_30 = arith.constant 0 : index
    %c0_31 = arith.constant 0 : index
    %61 = vector.load %arg10[%c0_30, %c0_31] : memref<256x128xbf16, #tpu.memory_space<vmem>>, vector<256x128xbf16>
    %cst_32 = arith.constant dense<0.000000e+00> : vector<48x128xf32>
    %62 = tpu.matmul %60, %61, %cst_32 {dimension_numbers = #tpu.dot_dimension_numbers<[1], [0], [0], [1], [0, 0, 1, 1], [], []>} : vector<48x256xbf16>, vector<256x128xbf16>, vector<48x128xf32> -> vector<48x128xf32>
    %c0_33 = arith.constant 0 : index
    %c0_34 = arith.constant 0 : index
    %63 = vector.load %arg11[%c0_33, %c0_34] : memref<1x128xf32, #tpu.memory_space<vmem>>, vector<1x128xf32>
    %64 = vector.broadcast %63 : vector<1x128xf32> to vector<48x128xf32>
    %65 = arith.addf %62, %64 : vector<48x128xf32>
    %cst_35 = arith.constant dense<0xFF800000> : vector<48xf32>
    %66 = vector.multi_reduction <maximumf>, %65, %cst_35 [1] : vector<48x128xf32> to vector<48xf32>
    %67 = vector.shape_cast %66 : vector<48xf32> to vector<48x1xf32>
    %68 = vector.broadcast %67 : vector<48x1xf32> to vector<48x128xf32>
    %69 = arith.subf %65, %68 : vector<48x128xf32>
    %70 = math.exp %69 : vector<48x128xf32>
    %cst_36 = arith.constant dense<0.000000e+00> : vector<48xf32>
    %71 = vector.multi_reduction <add>, %70, %cst_36 [1] : vector<48x128xf32> to vector<48xf32>
    %72 = vector.shape_cast %71 : vector<48xf32> to vector<48x1xf32>
    %73 = vector.broadcast %72 : vector<48x1xf32> to vector<48x128xf32>
    %74 = arith.divf %70, %73 : vector<48x128xf32>
    %c0_37 = arith.constant 0 : index
    %c0_38 = arith.constant 0 : index
    %75 = vector.load %arg12[%c0_37, %c0_38] : memref<48x128xf32, #tpu.memory_space<vmem>>, vector<48x128xf32>
    tpu.vector_store %arg12[%c0_37, %c0_38], %74 {strides = array<i32>} : memref<48x128xf32, #tpu.memory_space<vmem>>, vector<48x128xf32>,
    return
  }
  func.func @transform_0(%arg0: i32) -> (i32, i32) {
    %c0_i32 = arith.constant 0 : i32
    %c0_i32_0 = arith.constant 0 : i32
    return %arg0, %c0_i32 : i32, i32
  }
  func.func @transform_1(%arg0: i32) -> (i32, i32) {
    %c0_i32 = arith.constant 0 : i32
    %c0_i32_0 = arith.constant 0 : i32
    %c0_i32_1 = arith.constant 0 : i32
    return %c0_i32, %c0_i32_0 : i32, i32
  }
  func.func @transform_2(%arg0: i32) -> (i32, i32) {
    %c0_i32 = arith.constant 0 : i32
    %c0_i32_0 = arith.constant 0 : i32
    %c0_i32_1 = arith.constant 0 : i32
    return %c0_i32, %c0_i32_0 : i32, i32
  }
  func.func @transform_3(%arg0: i32) -> (i32, i32) {
    %c0_i32 = arith.constant 0 : i32
    %c0_i32_0 = arith.constant 0 : i32
    %c0_i32_1 = arith.constant 0 : i32
    return %c0_i32, %c0_i32_0 : i32, i32
  }
  func.func @transform_4(%arg0: i32) -> (i32, i32) {
    %c0_i32 = arith.constant 0 : i32
    %c0_i32_0 = arith.constant 0 : i32
    %c0_i32_1 = arith.constant 0 : i32
    return %c0_i32, %c0_i32_0 : i32, i32
  }
  func.func @transform_5(%arg0: i32) -> (i32, i32) {
    %c0_i32 = arith.constant 0 : i32
    %c0_i32_0 = arith.constant 0 : i32
    %c0_i32_1 = arith.constant 0 : i32
    return %c0_i32, %c0_i32_0 : i32, i32
  }
  func.func @transform_6(%arg0: i32) -> (i32, i32) {
    %c0_i32 = arith.constant 0 : i32
    %c0_i32_0 = arith.constant 0 : i32
    %c0_i32_1 = arith.constant 0 : i32
    return %c0_i32, %c0_i32_0 : i32, i32
  }
  func.func @transform_7(%arg0: i32) -> (i32, i32) {
    %c0_i32 = arith.constant 0 : i32
    %c0_i32_0 = arith.constant 0 : i32
    %c0_i32_1 = arith.constant 0 : i32
    return %c0_i32, %c0_i32_0 : i32, i32
  }
  func.func @transform_8(%arg0: i32) -> (i32, i32) {
    %c0_i32 = arith.constant 0 : i32
    %c0_i32_0 = arith.constant 0 : i32
    %c0_i32_1 = arith.constant 0 : i32
    return %c0_i32, %c0_i32_0 : i32, i32
  }
  func.func @transform_9(%arg0: i32) -> (i32, i32) {
    %c0_i32 = arith.constant 0 : i32
    %c0_i32_0 = arith.constant 0 : i32
    %c0_i32_1 = arith.constant 0 : i32
    return %c0_i32, %c0_i32_0 : i32, i32
  }
  func.func @transform_10(%arg0: i32) -> (i32, i32) {
    %c0_i32 = arith.constant 0 : i32
    %c0_i32_0 = arith.constant 0 : i32
    %c0_i32_1 = arith.constant 0 : i32
    return %c0_i32, %c0_i32_0 : i32, i32
  }
  func.func @transform_11(%arg0: i32) -> (i32, i32) {
    %c0_i32 = arith.constant 0 : i32
    %c0_i32_0 = arith.constant 0 : i32
    return %arg0, %c0_i32 : i32, i32
  }
}

</mosaic_0001>

<bundles_post_ra>
// kernel: tpu_custom_call.1
= control target key start
LH: loop header
LB: loop body
LE: loop exit
PB: predicated region body
PF: predicated region fallthrough
CT: control target
= control target key end

     0   :  { %16 = vsyncpa [#allocation3], 0  ;;  %s2013_s0 = inlined_call_operand.vmem [shape: bf16[48,32], index: 0, kind: input, shape index: {}]   ;;  %s2014_s1 = inlined_call_operand.vmem [shape: bf16[32,256], index: 1, kind: input, shape index: {}]   ;;  %s2015_s2 = inlined_call_operand.vmem [shape: f32[1,256], index: 2, kind: input, shape index: {}]   ;;  %s2016_s3 = inlined_call_operand.vmem [shape: f32[1,256], index: 3, kind: input, shape index: {}]   ;;  %s2017_s4 = inlined_call_operand.vmem [shape: f32[1,256], index: 4, kind: input, shape index: {}]   ;;  %s2018_s5 = inlined_call_operand.hbm [shape: bf16[256,256], index: 5, kind: input, shape index: {}]   ;;  %s2019_s6 = inlined_call_operand.vmem [shape: f32[1,256], index: 6, kind: input, shape index: {}]   ;;  %s2020_s7 = inlined_call_operand.vmem [shape: f32[1,256], index: 7, kind: input, shape index: {}]   ;;  %s2021_s8 = inlined_call_operand.vmem [shape: f32[1,256], index: 8, kind: input, shape index: {}]   ;;  %s2022_s9 = inlined_call_operand.hbm [shape: bf16[256,128], index: 9, kind: input, shape index: {}]   ;;  %s2023_s10 = inlined_call_operand.vmem [shape: f32[1,128], index: 10, kind: input, shape index: {}]   ;;  %s2024_s11 = inlined_call_operand.hbm [shape: f32[48,128], index: 11, kind: output, shape index: {}]  }
   0x1   :  { %17 = vsyncpa [#allocation6], 0 }
   0x2   :  { %18 = vsyncpa [#allocation4], 0  ;;  %s33_s19 = sshll.u32 %s2018_s5, 4  ;;  %s1646_s20 = smov [#allocation2]   ;;  %s34_s19 = int_to_ptr.hbm [resolvable:$true] %s33_s19 }
   0x3   :  { %s35_s21 = sshll.u32 %s1646_s20, 4  ;;  %s52_s24 = sshll.u32 %s2022_s9, 4  ;;  %s36_s21 = int_to_ptr.vmem [resolvable:$true] %s35_s21  ;;  %s53_s24 = int_to_ptr.hbm [resolvable:$true] %s52_s24 }
   0x4   :  { %s1647_s25 = smov 128   ;;  %s1648_s26 = smov 8  }
   0x5   :  { %41 = dma.hbm_to_vmem [thread:$0]  %s34_s19, 4096, %s36_s21, [#allocation3], %s1647_s25, %s1647_s25, %s1648_s26  }
   0x6   :  { %s1649_s27 = smov [#allocation5]   ;;  %s1650_s29 = smov 64  }
   0x7   :  { %s54_s28 = sshll.u32 %s1649_s27, 4  ;;  %s1651_s5 = smov 4   ;;  %s55_s28 = int_to_ptr.vmem [resolvable:$true] %s54_s28 }
   0x8   :  { %60 = dma.hbm_to_vmem [thread:$0]  %s53_s24, 2048, %s55_s28, [#allocation6], %s1650_s29, %s1650_s29, %s1651_s5  }
   0x9   :  { %1640 = dma.done.wait [#allocation3], 4096  }
   0xa   :  { %1641 = vsyncadd [#allocation3], 4294963200 }
   0xb   :  { %1642 = dma.done.wait [#allocation6], 2048  }
   0xc   :  { %1643 = vsyncadd [#allocation6], 4294965248  ;;  %v1250_v0 = vld [vmem:[%s2014_s1 + $0x10] sm:$0xf]  ;;  %v1460_v1 = vld [vmem:[%s2014_s1 + $0x14] sm:$0xf0] }
   0xd   :  { %v1459_v2 = vld [vmem:[%s2014_s1 + $0x14] sm:$0xf]  ;;  %v1251_v3 = vor.u32 %v1460_v1, %v1250_v0  ;;  %v1252_v4 = vld [vmem:[%s2014_s1 + $0x18] sm:$0xf0]  ;;  %v1242_v5 = vld [vmem:[%s2014_s1] sm:$0xf] }
   0xe   :  { %v1458_v6 = vld [vmem:[%s2014_s1 + $0x4] sm:$0xf0]  ;;  %v1255_v7 = vor.u32 %v1459_v2, %v1252_v4  ;;  %v1457_v8 = vld [vmem:[%s2014_s1 + $0x4] sm:$0xf]  ;;  %v1244_v9 = vld [vmem:[%s2014_s1 + $0x8] sm:$0xf0] }
   0xf   :  { %139 = vmatpush.bf16.msra.mxu0 %v1251_v3  ;;  %v1243_v10 = vor.u32 %v1458_v6, %v1242_v5  ;;  %v1247_v11 = vor.u32 %v1457_v8, %v1244_v9  ;;  %v1454_v12 = vld [vmem:[%s2013_s0] sm:$0xff]  ;;  %vm123_vm0 = vcmask 261120   ;;  %v1455_v13 = vld [vmem:[%s2013_s0 + $0x8] sm:$0xff]  ;;  %v1456_v14 = vld [vmem:[%s2013_s0 + $0x10] sm:$0xff]  ;;  %v1652_v48 = vmov 256.0   ;;  %s1214_s22 = sshll.u32 %s2024_s11, 4  ;;  %s1215_s22 = int_to_ptr.hbm [resolvable:$true] %s1214_s22 }
  0x10   :  { %163 = vmatpush.bf16.msra.mxu1 %v1255_v7  ;;  %v82_v15 = vld [vmem:[%s2015_s2] sm:$0x3]  ;;  %1518 = vrcp.f32 %v1652_v48  ;;  %v1475_v7 = vld [vmem:[#allocation2 + $0x74] sm:$0xf]  ;;  %v1322_v8 = vld [vmem:[#allocation2 + $0x78] sm:$0xf0] }
  0x11   :  { %v84_v16 = vperm.slane %v82_v15, 0  ;;  %v85_v17 = vperm.slane %v82_v15, 1  ;;  %v1325_v9 = vor.u32 %v1475_v7, %v1322_v8  ;;  %v1368_v7 = vld [vmem:[#allocation2 + $0xd0] sm:$0xf]  ;;  %v1488_v8 = vld [vmem:[#allocation2 + $0xd4] sm:$0xf0] }
  0x13   :  { %140 = vmatpush.bf16.msra.mxu0 %v1243_v10 }
  0x14   :  { %164 = vmatpush.bf16.msra.mxu1 %v1247_v11 }
  0x16   :  { %1256 = vmatmul.msk.bf16.vlgmr.msra.gmra.mxu0 %vm123_vm0, %v1454_v12  ;;  %v1519_v49 = vpop.eup %1518 }
  0x17   :  { %1259 = vmatmul.msk.bf16.vlgmr.msra.gmra.mxu1 %vm123_vm0, %v1454_v12  ;;  %v202_v50 = vmul.f32 256.0, %v1519_v49  ;;  %vm206_vm1 = vweird.f32 %v1519_v49  ;;  %638 = vmatpush.bf16.msrb.mxu0 %v1325_v9  ;;  %v1369_v9 = vor.u32 %v1488_v8, %v1368_v7  ;;  %v1338_v7 = vld [vmem:[#allocation2 + $0x98] sm:$0xf0] }
  0x19   :  { %v203_v51 = vsub.f32 1.0, %v202_v50  ;;  %v1312_v50 = vld [vmem:[#allocation2 + $0x60] sm:$0xf] }
  0x1b   :  { %v204_v52 = vmul.f32 %v1519_v49, %v203_v51  ;;  %v1474_v51 = vld [vmem:[#allocation2 + $0x64] sm:$0xf0] }
  0x1d   :  { %v205_v53 = vadd.f32 %v1519_v49, %v204_v52 }
  0x1f   :  { %v1759_v54 = vsel %vm206_vm1, %v1519_v49, %v205_v53  ;;  %v1378_v49 = vld [vmem:[#allocation2 + $0xe8] sm:$0xf0]  ;;  %v1313_v53 = vor.u32 %v1474_v51, %v1312_v50  ;;  %v1481_v51 = vld [vmem:[#allocation2 + $0xa4] sm:$0xf] }
  0x26   :  { %1257 = vmatmul.msk.bf16.gmra.mxu0 %vm123_vm0, %v1455_v13 }
  0x27   :  { %1260 = vmatmul.msk.bf16.gmra.mxu1 %vm123_vm0, %v1455_v13 }
  0x36   :  { %1258 = vmatmul.msk.bf16.gmra.mxu0 %vm123_vm0, %v1456_v14 }
  0x37   :  { %1261 = vmatmul.msk.bf16.gmra.mxu1 %vm123_vm0, %v1456_v14 }
  0x93   :  { %v142_v18 = vpop.f32.mrf.mxu0 }
  0x94   :  { %v143_v19 = vadd.f32 %v142_v18, %v84_v16  ;;  %v166_v20 = vpop.f32.mrf.mxu1 }
  0x95   :  { %v167_v21 = vadd.f32 %v166_v20, %v85_v17 }
  0x97   :  { %v183_v22 = vadd.f32 %v167_v21, %v143_v19 }
  0x99   :  { %184 = vadd.xlane.f32.xlu0 %v183_v22 }
  0x9b   :  { %v144_v23 = vpop.f32.mrf.mxu0 }
  0x9c   :  { %v145_v24 = vadd.f32 %v144_v23, %v84_v16  ;;  %v168_v25 = vpop.f32.mrf.mxu1 }
  0x9d   :  { %v169_v26 = vadd.f32 %v168_v25, %v85_v17 }
  0x9f   :  { %v186_v27 = vadd.f32 %v169_v26, %v145_v24 }
  0xa1   :  { %187 = vadd.xlane.f32.xlu0 %v186_v27 }
  0xa3   :  { %v147_v28 = vpop.f32.mrf.mxu0 }
  0xa4   :  { %v148_v29 = vadd.f32 %v147_v28, %v84_v16  ;;  %v171_v30 = vpop.f32.mrf.mxu1 }
  0xa5   :  { %v172_v31 = vadd.f32 %v171_v30, %v85_v17 }
  0xa7   :  { %v189_v32 = vadd.f32 %v172_v31, %v148_v29 }
  0xa9   :  { %190 = vadd.xlane.f32.xlu1 %v189_v32 }
  0xab   :  { %v149_v33 = vpop.f32.mrf.mxu0 }
  0xac   :  { %v150_v34 = vadd.f32 %v149_v33, %v84_v16  ;;  %v173_v35 = vpop.f32.mrf.mxu1 }
  0xad   :  { %v174_v36 = vadd.f32 %v173_v35, %v85_v17 }
  0xaf   :  { %v192_v37 = vadd.f32 %v174_v36, %v150_v34 }
  0xb1   :  { %193 = vadd.xlane.f32.xlu1 %v192_v37  ;;  %v1386_v37 = vld [vmem:[#allocation2 + $0xf8] sm:$0xf0] }
  0xb3   :  { %v152_v38 = vpop.f32.mrf.mxu0 }
  0xb4   :  { %v153_v39 = vadd.f32 %v152_v38, %v84_v16  ;;  %v176_v40 = vpop.f32.mrf.mxu1  ;;  %v1320_v38 = vld [vmem:[#allocation2 + $0x70] sm:$0xf] }
  0xb5   :  { %v177_v41 = vadd.f32 %v176_v40, %v85_v17  ;;  %v1476_v40 = vld [vmem:[#allocation2 + $0x74] sm:$0xf0] }
  0xb7   :  { %v195_v42 = vadd.f32 %v177_v41, %v153_v39 }
  0xb9   :  { %196 = vadd.xlane.f32.xlu2 %v195_v42  ;;  %v1492_v42 = vld [vmem:[#allocation2 + $0xf4] sm:$0xf0] }
  0xbb   :  { %v154_v43 = vpop.f32.mrf.mxu0 }
  0xbc   :  { %v155_v44 = vadd.f32 %v154_v43, %v84_v16  ;;  %v178_v45 = vpop.f32.mrf.mxu1  ;;  %v1321_v43 = vor.u32 %v1476_v40, %v1320_v38  ;;  %v1484_v40 = vld [vmem:[#allocation2 + $0xb4] sm:$0xf0] }
  0xbd   :  { %v179_v46 = vadd.f32 %v178_v45, %v85_v17  ;;  %v1473_v45 = vld [vmem:[#allocation2 + $0x64] sm:$0xf] }
  0xbe   :  { %590 = vmatpush.bf16.msra.mxu2 %v1321_v43  ;;  %v1282_v43 = vld [vmem:[#allocation2 + $0x28] sm:$0xf0] }
  0xbf   :  { %v198_v47 = vadd.f32 %v179_v46, %v155_v44 }
  0xc1   :  { %199 = vadd.xlane.f32.xlu2 %v198_v47  ;;  %v1489_v47 = vld [vmem:[#allocation2 + $0xe4] sm:$0xf] }
  0xc2   :  { %v1381_v52 = vor.u32 %v1489_v47, %v1378_v49  ;;  %591 = vmatpush.bf16.msra.mxu2 %v1313_v53  ;;  %v1344_v47 = vld [vmem:[#allocation2 + $0xa0] sm:$0xf] }
 0x10c   :  { %v185_v55 = vpop.xlane.xlu0 %184 }
 0x10d   :  { %v208_v56 = vmul.f32 %v1759_v54, %v185_v55  ;;  %v1376_v55 = vld [vmem:[#allocation2 + $0xe0] sm:$0xf] }
 0x10f   :  { %v1762_v57 = vsub.f32 %v143_v19, %v208_v56  ;;  %v1764_v58 = vsub.f32 %v167_v21, %v208_v56  ;;  %v1490_v56 = vld [vmem:[#allocation2 + $0xe4] sm:$0xf0] }
 0x111   :  { %v226_v59 = vmul.f32 %v1762_v57, %v1762_v57  ;;  %v227_v60 = vmul.f32 %v1764_v58, %v1764_v58 }
 0x113   :  { %v238_v61 = vadd.f32 %v227_v60, %v226_v59  ;;  %v1377_v59 = vor.u32 %v1490_v56, %v1376_v55  ;;  %v1471_v60 = vld [vmem:[#allocation2 + $0x54] sm:$0xf]  ;;  %v1272_v55 = vld [vmem:[#allocation2 + $0x10] sm:$0xf]  ;;  %v1464_v56 = vld [vmem:[#allocation2 + $0x14] sm:$0xf0] }
 0x114   :  { %v188_v62 = vpop.xlane.xlu0 %187 }
 0x115   :  { %v209_v63 = vmul.f32 %v1759_v54, %v188_v62  ;;  %239 = vadd.xlane.f32.xlu0 %v238_v61  ;;  %v1306_v61 = vld [vmem:[#allocation2 + $0x58] sm:$0xf0]  ;;  %v1487_v62 = vld [vmem:[#allocation2 + $0xd4] sm:$0xf] }
 0x117   :  { %v1771_v0 = vsub.f32 %v145_v24, %v209_v63  ;;  %v1773_v1 = vsub.f32 %v169_v26, %v209_v63  ;;  %v1309_v63 = vor.u32 %v1471_v60, %v1306_v61  ;;  %v1273_v61 = vor.u32 %v1464_v56, %v1272_v55 }
 0x119   :  { %v228_v2 = vmul.f32 %v1771_v0, %v1771_v0  ;;  %v229_v3 = vmul.f32 %v1773_v1, %v1773_v1 }
 0x11b   :  { %v241_v4 = vadd.f32 %v229_v3, %v228_v2  ;;  %v1370_v2 = vld [vmem:[#allocation2 + $0xd8] sm:$0xf0]  ;;  %v1304_v3 = vld [vmem:[#allocation2 + $0x50] sm:$0xf] }
 0x11c   :  { %v191_v5 = vpop.xlane.xlu1 %190 }
 0x11d   :  { %v210_v6 = vmul.f32 %v1759_v54, %v191_v5  ;;  %242 = vadd.xlane.f32.xlu1 %v241_v4  ;;  %v1472_v4 = vld [vmem:[#allocation2 + $0x54] sm:$0xf0]  ;;  %v1373_v5 = vor.u32 %v1487_v62, %v1370_v2  ;;  %v1274_v2 = vld [vmem:[#allocation2 + $0x18] sm:$0xf0] }
 0x11e   :  { %v1480_v62 = vld [vmem:[#allocation2 + $0x94] sm:$0xf0] }
 0x11f   :  { %v1780_v10 = vsub.f32 %v148_v29, %v210_v6  ;;  %v1782_v11 = vsub.f32 %v172_v31, %v210_v6  ;;  %v1305_v6 = vor.u32 %v1472_v4, %v1304_v3 }
 0x121   :  { %v230_v12 = vmul.f32 %v1780_v10, %v1780_v10  ;;  %v231_v13 = vmul.f32 %v1782_v11, %v1782_v11  ;;  %592 = vmatpush.bf16.msra.mxu2 %v1305_v6  ;;  %v1479_v6 = vld [vmem:[#allocation2 + $0x94] sm:$0xf] }
 0x122   :  { %v1341_v8 = vor.u32 %v1479_v6, %v1338_v7 }
 0x123   :  { %v244_v14 = vadd.f32 %v231_v13, %v230_v12  ;;  %v1469_v12 = vld [vmem:[#allocation2 + $0x44] sm:$0xf]  ;;  %v1298_v13 = vld [vmem:[#allocation2 + $0x48] sm:$0xf0] }
 0x124   :  { %v194_v15 = vpop.xlane.xlu1 %193 }
 0x125   :  { %v211_v16 = vmul.f32 %v1759_v54, %v194_v15  ;;  %245 = vadd.xlane.f32.xlu2 %v244_v14  ;;  %v1485_v14 = vld [vmem:[#allocation2 + $0xc4] sm:$0xf]  ;;  %v1301_v15 = vor.u32 %v1469_v12, %v1298_v13  ;;  %v1264_v12 = vld [vmem:[#allocation2] sm:$0xf]  ;;  %v1462_v13 = vld [vmem:[#allocation2 + $0x4] sm:$0xf0] }
 0x127   :  { %v1789_v17 = vsub.f32 %v150_v34, %v211_v16  ;;  %v1791_v18 = vsub.f32 %v174_v36, %v211_v16  ;;  %v1491_v36 = vld [vmem:[#allocation2 + $0xf4] sm:$0xf]  ;;  %v1362_v16 = vld [vmem:[#allocation2 + $0xc8] sm:$0xf0] }
 0x129   :  { %v232_v19 = vmul.f32 %v1789_v17, %v1789_v17  ;;  %v233_v20 = vmul.f32 %v1791_v18, %v1791_v18 }
 0x12b   :  { %v247_v21 = vadd.f32 %v233_v20, %v232_v19  ;;  %v1296_v19 = vld [vmem:[#allocation2 + $0x40] sm:$0xf]  ;;  %v1470_v20 = vld [vmem:[#allocation2 + $0x44] sm:$0xf0] }
 0x12c   :  { %v197_v22 = vpop.xlane.xlu2 %196 }
 0x12d   :  { %v212_v23 = vmul.f32 %v1759_v54, %v197_v22  ;;  %248 = vadd.xlane.f32.xlu0 %v247_v21  ;;  %v1365_v21 = vor.u32 %v1485_v14, %v1362_v16  ;;  %v1297_v22 = vor.u32 %v1470_v20, %v1296_v19  ;;  %v1265_v14 = vor.u32 %v1462_v13, %v1264_v12  ;;  %v1478_v16 = vld [vmem:[#allocation2 + $0x84] sm:$0xf0]  ;;  %v1461_v19 = vld [vmem:[#allocation2 + $0x4] sm:$0xf] }
 0x12f   :  { %v1798_v24 = vsub.f32 %v153_v39, %v212_v23  ;;  %v1800_v25 = vsub.f32 %v177_v41, %v212_v23  ;;  %v1389_v39 = vor.u32 %v1491_v36, %v1386_v37  ;;  %v1384_v41 = vld [vmem:[#allocation2 + $0xf0] sm:$0xf]  ;;  %v1360_v23 = vld [vmem:[#allocation2 + $0xc0] sm:$0xf]  ;;  %593 = vmatpush.bf16.msra.mxu2 %v1297_v22  ;;  %v1468_v36 = vld [vmem:[#allocation2 + $0x34] sm:$0xf0] }
 0x130   :  { %v1477_v22 = vld [vmem:[#allocation2 + $0x84] sm:$0xf] }
 0x131   :  { %v234_v26 = vmul.f32 %v1798_v24, %v1798_v24  ;;  %v235_v27 = vmul.f32 %v1800_v25, %v1800_v25  ;;  %662 = vmatpush.bf16.msrb.mxu1 %v1389_v39  ;;  %v1352_v39 = vld [vmem:[#allocation2 + $0xb0] sm:$0xf] }
 0x133   :  { %v250_v28 = vadd.f32 %v235_v27, %v234_v26  ;;  %v1486_v26 = vld [vmem:[#allocation2 + $0xc4] sm:$0xf0] }
 0x134   :  { %v200_v29 = vpop.xlane.xlu2 %199  ;;  %v1361_v27 = vor.u32 %v1486_v26, %v1360_v23  ;;  %v1330_v23 = vld [vmem:[#allocation2 + $0x88] sm:$0xf0] }
 0x135   :  { %v213_v30 = vmul.f32 %v1759_v54, %v200_v29  ;;  %251 = vadd.xlane.f32.xlu1 %v250_v28  ;;  %663 = vmatpush.bf16.msrb.mxu1 %v1381_v52  ;;  %v1467_v28 = vld [vmem:[#allocation2 + $0x34] sm:$0xf]  ;;  %v1290_v29 = vld [vmem:[#allocation2 + $0x38] sm:$0xf0]  ;;  %v1346_v52 = vld [vmem:[#allocation2 + $0xa8] sm:$0xf0] }
 0x136   :  { %v1349_v53 = vor.u32 %v1481_v51, %v1346_v52 }
 0x137   :  { %v1807_v31 = vsub.f32 %v155_v44, %v213_v30  ;;  %v1809_v32 = vsub.f32 %v179_v46, %v213_v30  ;;  %v1385_v44 = vor.u32 %v1492_v42, %v1384_v41  ;;  %v1314_v46 = vld [vmem:[#allocation2 + $0x68] sm:$0xf0]  ;;  %v1483_v30 = vld [vmem:[#allocation2 + $0xb4] sm:$0xf]  ;;  %v1353_v41 = vor.u32 %v1484_v40, %v1352_v39  ;;  %v1465_v42 = vld [vmem:[#allocation2 + $0x24] sm:$0xf] }
 0x138   :  { %v1317_v48 = vor.u32 %v1473_v45, %v1314_v46  ;;  %v1285_v45 = vor.u32 %v1465_v42, %v1282_v43  ;;  %v1466_v46 = vld [vmem:[#allocation2 + $0x24] sm:$0xf0] }
 0x139   :  { %v236_v33 = vmul.f32 %v1807_v31, %v1807_v31  ;;  %v237_v34 = vmul.f32 %v1809_v32, %v1809_v32  ;;  %614 = vmatpush.bf16.msra.mxu3 %v1385_v44  ;;  %664 = vmatpush.bf16.msrb.mxu1 %v1373_v5  ;;  %v1280_v44 = vld [vmem:[#allocation2 + $0x20] sm:$0xf] }
 0x13a   :  { %639 = vmatpush.bf16.msrb.mxu0 %v1317_v48  ;;  %v1482_v48 = vld [vmem:[#allocation2 + $0xa4] sm:$0xf0]  ;;  %v1281_v49 = vor.u32 %v1466_v46, %v1280_v44  ;;  %v181_v44 = vld [vmem:[%s2016_s3] sm:$0x3] }
 0x13b   :  { %v253_v35 = vadd.f32 %v237_v34, %v236_v33  ;;  %v1293_v33 = vor.u32 %v1467_v28, %v1290_v29  ;;  %v1354_v34 = vld [vmem:[#allocation2 + $0xb8] sm:$0xf0]  ;;  %v1345_v50 = vor.u32 %v1482_v48, %v1344_v47  ;;  %v1825_v51 = vperm.slane %v181_v44, 0 }
 0x13c   :  { %v1357_v37 = vor.u32 %v1483_v30, %v1354_v34  ;;  %v1829_v55 = vperm.slane %v181_v44, 1 }
 0x13d   :  { %254 = vadd.xlane.f32.xlu2 %v253_v35  ;;  %615 = vmatpush.bf16.msra.mxu3 %v1377_v59  ;;  %v1288_v35 = vld [vmem:[#allocation2 + $0x30] sm:$0xf] }
 0x13e   :  { %640 = vmatpush.bf16.msrb.mxu0 %v1309_v63  ;;  %665 = vmatpush.bf16.msrb.mxu1 %v1365_v21  ;;  %v1289_v38 = vor.u32 %v1468_v36, %v1288_v35  ;;  %v1336_v59 = vld [vmem:[#allocation2 + $0x90] sm:$0xf]  ;;  %v1463_v63 = vld [vmem:[#allocation2 + $0x14] sm:$0xf]  ;;  %v1266_v21 = vld [vmem:[#allocation2 + $0x8] sm:$0xf0] }
 0x13f   :  { %v1337_v4 = vor.u32 %v1480_v62, %v1336_v59  ;;  %v1277_v5 = vor.u32 %v1463_v63, %v1274_v2  ;;  %v1269_v26 = vor.u32 %v1461_v19, %v1266_v21 }
 0x140   :  { %594 = vmatpush.bf16.msra.mxu2 %v1289_v38 }
 0x141   :  { %616 = vmatpush.bf16.msra.mxu3 %v1369_v9 }
 0x142   :  { %641 = vmatpush.bf16.msrb.mxu0 %v1301_v15  ;;  %666 = vmatpush.bf16.msrb.mxu1 %v1357_v37  ;;  %v1328_v15 = vld [vmem:[#allocation2 + $0x80] sm:$0xf] }
 0x143   :  { %v1329_v20 = vor.u32 %v1478_v16, %v1328_v15 }
 0x144   :  { %595 = vmatpush.bf16.msra.mxu2 %v1281_v49  ;;  %v182_v49 = vld [vmem:[%s2017_s4] sm:$0x3] }
 0x145   :  { %617 = vmatpush.bf16.msra.mxu3 %v1361_v27  ;;  %v1333_v27 = vor.u32 %v1477_v22, %v1330_v23 }
 0x146   :  { %642 = vmatpush.bf16.msrb.mxu0 %v1293_v33  ;;  %667 = vmatpush.bf16.msrb.mxu1 %v1349_v53 }
 0x148   :  { %596 = vmatpush.bf16.msra.mxu2 %v1273_v61  ;;  %v1831_v61 = vperm.slane %v182_v49, 0 }
 0x149   :  { %618 = vmatpush.bf16.msra.mxu3 %v1353_v41 }
 0x14a   :  { %643 = vmatpush.bf16.msrb.mxu0 %v1285_v45  ;;  %668 = vmatpush.bf16.msrb.mxu1 %v1341_v8 }
 0x14c   :  { %597 = vmatpush.bf16.msra.mxu2 %v1265_v14 }
 0x14d   :  { %619 = vmatpush.bf16.msra.mxu3 %v1345_v50 }
 0x14e   :  { %644 = vmatpush.bf16.msrb.mxu0 %v1277_v5  ;;  %669 = vmatpush.bf16.msrb.mxu1 %v1333_v27 }
 0x151   :  { %620 = vmatpush.bf16.msra.mxu3 %v1337_v4 }
 0x152   :  { %645 = vmatpush.bf16.msrb.mxu0 %v1269_v26 }
 0x155   :  { %621 = vmatpush.bf16.msra.mxu3 %v1329_v20 }
 0x188   :  { %v240_v60 = vpop.xlane.xlu0 %239 }
 0x189   :  { %v256_v3 = vmul.f32 %v240_v60, %v1759_v54 }
 0x18b   :  { %v262_v9 = vadd.f32 1e-05, %v256_v3  ;;  %v1835_v3 = vperm.slane %v182_v49, 1 }
 0x18d   :  { %1520 = vrsqrt.f32 %v262_v9  ;;  %vm274_vm3 = vweird.f32 %v262_v9 }
 0x190   :  { %v243_v28 = vpop.xlane.xlu1 %242 }
 0x191   :  { %v257_v29 = vmul.f32 %v243_v28, %v1759_v54 }
 0x193   :  { %v1521_v30 = vpop.eup %1520  ;;  %v263_v33 = vadd.f32 1e-05, %v257_v29 }
 0x194   :  { %v269_v34 = vmul.f32 %v1521_v30, %v262_v9  ;;  %vm275_vm2 = vweird.f32 %v1521_v30 }
 0x195   :  { %1522 = vrsqrt.f32 %v263_v33  ;;  %vm276_vm4 = vmor %vm274_vm3, %vm275_vm2  ;;  %vm284_vm6 = vweird.f32 %v263_v33 }
 0x196   :  { %v270_v35 = vmul.f32 %v1521_v30, %v269_v34 }
 0x198   :  { %v271_v36 = vmul.f32 0.5, %v270_v35  ;;  %v246_v37 = vpop.xlane.xlu2 %245 }
 0x199   :  { %v258_v38 = vmul.f32 %v246_v37, %v1759_v54 }
 0x19a   :  { %v272_v39 = vsub.f32 1.5, %v271_v36 }
 0x19b   :  { %v1523_v40 = vpop.eup %1522  ;;  %v264_v41 = vadd.f32 1e-05, %v258_v38 }
 0x19c   :  { %v273_v42 = vmul.f32 %v1521_v30, %v272_v39  ;;  %v279_v43 = vmul.f32 %v1523_v40, %v263_v33  ;;  %vm285_vm5 = vweird.f32 %v1523_v40 }
 0x19d   :  { %1524 = vrsqrt.f32 %v264_v41  ;;  %vm286_vm7 = vmor %vm284_vm6, %vm285_vm5  ;;  %vm294_vm9 = vweird.f32 %v264_v41 }
 0x19e   :  { %v277_v45 = vsel %vm276_vm4, %v1521_v30, %v273_v42  ;;  %v280_v46 = vmul.f32 %v1523_v40, %v279_v43 }
 0x19f   :  { %v328_v50 = vmul.f32 %v277_v45, %v1762_v57  ;;  %v329_v53 = vmul.f32 %v277_v45, %v1764_v58 }
 0x1a0   :  { %v281_v47 = vmul.f32 0.5, %v280_v46  ;;  %v249_v48 = vpop.xlane.xlu0 %248 }
 0x1a1   :  { %v259_v52 = vmul.f32 %v249_v48, %v1759_v54  ;;  %v345_v2 = vmul.f32 %v1825_v51, %v328_v50  ;;  %v346_v57 = vmul.f32 %v1829_v55, %v329_v53 }
 0x1a2   :  { %v282_v56 = vsub.f32 1.5, %v281_v47 }
 0x1a3   :  { %v1525_v59 = vpop.eup %1524  ;;  %v265_v60 = vadd.f32 1e-05, %v259_v52  ;;  %v362_v9 = vadd.f32 %v1831_v61, %v345_v2  ;;  %v363_v15 = vadd.f32 %v1835_v3, %v346_v57 }
 0x1a4   :  { %v283_v62 = vmul.f32 %v1523_v40, %v282_v56  ;;  %v289_v63 = vmul.f32 %v1525_v59, %v264_v41  ;;  %vm295_vm8 = vweird.f32 %v1525_v59 }
 0x1a5   :  { %1526 = vrsqrt.f32 %v265_v60  ;;  %v374_v23 = vmax.f32 %v362_v9, 0.0  ;;  %vm296_vm10 = vmor %vm294_vm9, %vm295_vm8  ;;  %v375_v27 = vmax.f32 %v363_v15, 0.0  ;;  %vm304_vm12 = vweird.f32 %v265_v60 }
 0x1a6   :  { %v287_v58 = vsel %vm286_vm7, %v1523_v40, %v283_v62  ;;  %v290_v4 = vmul.f32 %v1525_v59, %v289_v63 }
 0x1a7   :  { %v330_v5 = vmul.f32 %v287_v58, %v1771_v0  ;;  %v331_v6 = vmul.f32 %v287_v58, %v1773_v1 }
 0x1a8   :  { %v291_v7 = vmul.f32 0.5, %v290_v4  ;;  %v252_v8 = vpop.xlane.xlu1 %251 }
 0x1a9   :  { %v260_v12 = vmul.f32 %v252_v8, %v1759_v54  ;;  %v347_v13 = vmul.f32 %v1825_v51, %v330_v5  ;;  %v348_v14 = vmul.f32 %v1829_v55, %v331_v6 }
 0x1aa   :  { %v292_v16 = vsub.f32 1.5, %v291_v7 }
 0x1ab   :  { %v1527_v19 = vpop.eup %1526  ;;  %v266_v20 = vadd.f32 1e-05, %v260_v12  ;;  %v364_v0 = vadd.f32 %v1831_v61, %v347_v13  ;;  %v365_v1 = vadd.f32 %v1835_v3, %v348_v14 }
 0x1ac   :  { %v293_v21 = vmul.f32 %v1525_v59, %v292_v16  ;;  %v299_v22 = vmul.f32 %v1527_v19, %v265_v60  ;;  %vm305_vm11 = vweird.f32 %v1527_v19 }
 0x1ad   :  { %1528 = vrsqrt.f32 %v266_v20  ;;  %v376_v26 = vmax.f32 %v364_v0, 0.0  ;;  %v377_v28 = vmax.f32 %v365_v1, 0.0  ;;  %vm306_vm13 = vmor %vm304_vm12, %vm305_vm11  ;;  %vm314_vm15 = vweird.f32 %v266_v20 }
 0x1ae   :  { %v297_v29 = vsel %vm296_vm10, %v1525_v59, %v293_v21  ;;  %v300_v30 = vmul.f32 %v1527_v19, %v299_v22 }
 0x1af   :  { %v386_v33 = vpack.c.bf16 %v376_v26, %v374_v23  ;;  %v387_v34 = vpack.c.bf16 %v377_v28, %v375_v27  ;;  %v332_v38 = vmul.f32 %v297_v29, %v1780_v10  ;;  %v333_v39 = vmul.f32 %v297_v29, %v1782_v11 }
 0x1b0   :  { %v301_v35 = vmul.f32 0.5, %v300_v30  ;;  %v255_v36 = vpop.xlane.xlu2 %254 }
 0x1b1   :  { %v261_v37 = vmul.f32 %v255_v36, %v1759_v54  ;;  %598 = vmatmul.bf16.vlgmr.msra.gmra.mxu2 %v386_v33  ;;  %622 = vmatmul.bf16.vlgmr.msra.gmra.mxu3 %v387_v34  ;;  %v349_v45 = vmul.f32 %v1825_v51, %v332_v38  ;;  %v350_v46 = vmul.f32 %v1829_v55, %v333_v39 }
 0x1b2   :  { %v302_v40 = vsub.f32 1.5, %v301_v35  ;;  %646 = vmatmul.bf16.vlgmr.msrb.gmra.mxu0 %v386_v33  ;;  %670 = vmatmul.bf16.vlgmr.msrb.gmra.mxu1 %v387_v34 }
 0x1b3   :  { %v1529_v41 = vpop.eup %1528  ;;  %v267_v42 = vadd.f32 1e-05, %v261_v37  ;;  %v366_v52 = vadd.f32 %v1831_v61, %v349_v45  ;;  %v367_v56 = vadd.f32 %v1835_v3, %v350_v46 }
 0x1b4   :  { %v303_v43 = vmul.f32 %v1527_v19, %v302_v40  ;;  %v309_v44 = vmul.f32 %v1529_v41, %v266_v20  ;;  %vm315_vm14 = vweird.f32 %v1529_v41 }
 0x1b5   :  { %1530 = vrsqrt.f32 %v267_v42  ;;  %vm316_vm0 = vmor %vm314_vm15, %vm315_vm14  ;;  %v379_v58 = vmax.f32 %v367_v56, 0.0  ;;  %vm324_vm2 = vweird.f32 %v267_v42 }
 0x1b6   :  { %v307_v47 = vsel %vm306_vm13, %v1527_v19, %v303_v43  ;;  %v310_v48 = vmul.f32 %v1529_v41, %v309_v44 }
 0x1b7   :  { %v334_v10 = vmul.f32 %v307_v47, %v1789_v17  ;;  %v335_v11 = vmul.f32 %v307_v47, %v1791_v18  ;;  %v378_v18 = vmax.f32 %v366_v52, 0.0 }
 0x1b8   :  { %v311_v49 = vmul.f32 0.5, %v310_v48 }
 0x1b9   :  { %v351_v50 = vmul.f32 %v1825_v51, %v334_v10  ;;  %v352_v53 = vmul.f32 %v1829_v55, %v335_v11 }
 0x1ba   :  { %v312_v59 = vsub.f32 1.5, %v311_v49 }
 0x1bb   :  { %v1531_v60 = vpop.eup %1530  ;;  %v368_v62 = vadd.f32 %v1831_v61, %v351_v50  ;;  %v369_v63 = vadd.f32 %v1835_v3, %v352_v53 }
 0x1bc   :  { %v313_v2 = vmul.f32 %v1529_v41, %v312_v59  ;;  %v319_v17 = vmul.f32 %v1531_v60, %v267_v42  ;;  %vm325_vm1 = vweird.f32 %v1531_v60 }
 0x1bd   :  { %v380_v57 = vmax.f32 %v368_v62, 0.0  ;;  %v381_v4 = vmax.f32 %v369_v63, 0.0  ;;  %vm326_vm3 = vmor %vm324_vm2, %vm325_vm1 }
 0x1be   :  { %v317_v5 = vsel %vm316_vm0, %v1529_v41, %v313_v2  ;;  %v320_v6 = vmul.f32 %v1531_v60, %v319_v17 }
 0x1bf   :  { %v388_v7 = vpack.c.bf16 %v380_v57, %v378_v18  ;;  %v389_v8 = vpack.c.bf16 %v381_v4, %v379_v58  ;;  %v336_v12 = vmul.f32 %v317_v5, %v1798_v24  ;;  %v337_v13 = vmul.f32 %v317_v5, %v1800_v25 }
 0x1c0   :  { %v321_v9 = vmul.f32 0.5, %v320_v6 }
 0x1c1   :  { %603 = vmatmul.bf16.gmra.mxu2 %v388_v7  ;;  %627 = vmatmul.bf16.gmra.mxu3 %v389_v8  ;;  %v353_v16 = vmul.f32 %v1825_v51, %v336_v12  ;;  %v354_v19 = vmul.f32 %v1829_v55, %v337_v13 }
 0x1c2   :  { %v322_v14 = vsub.f32 1.5, %v321_v9  ;;  %651 = vmatmul.bf16.gmra.mxu0 %v388_v7  ;;  %675 = vmatmul.bf16.gmra.mxu1 %v389_v8 }
 0x1c3   :  { %v370_v25 = vadd.f32 %v1831_v61, %v353_v16  ;;  %v371_v22 = vadd.f32 %v1835_v3, %v354_v19 }
 0x1c4   :  { %v323_v15 = vmul.f32 %v1531_v60, %v322_v14 }
 0x1c5   :  { %v382_v27 = vmax.f32 %v370_v25, 0.0  ;;  %v383_v29 = vmax.f32 %v371_v22, 0.0 }
 0x1c6   :  { %v327_v20 = vsel %vm326_vm3, %v1531_v60, %v323_v15 }
 0x1c7   :  { %v338_v0 = vmul.f32 %v327_v20, %v1807_v31  ;;  %v339_v1 = vmul.f32 %v327_v20, %v1809_v32  ;;  %v424_v32 = vld [vmem:[%s2019_s6] sm:$0x3] }
 0x1c9   :  { %v355_v24 = vmul.f32 %v1825_v51, %v338_v0  ;;  %v356_v21 = vmul.f32 %v1829_v55, %v339_v1  ;;  %v427_v51 = vperm.slane %v424_v32, 1 }
 0x1cb   :  { %v372_v23 = vadd.f32 %v1831_v61, %v355_v24  ;;  %v373_v26 = vadd.f32 %v1835_v3, %v356_v21  ;;  %v426_v61 = vperm.slane %v424_v32, 0 }
 0x1cd   :  { %v384_v28 = vmax.f32 %v372_v23, 0.0  ;;  %v385_v30 = vmax.f32 %v373_v26, 0.0 }
 0x1cf   :  { %v390_v33 = vpack.c.bf16 %v384_v28, %v382_v27  ;;  %v391_v31 = vpack.c.bf16 %v385_v30, %v383_v29 }
 0x1d1   :  { %608 = vmatmul.bf16.gmra.mxu2 %v390_v33  ;;  %632 = vmatmul.bf16.gmra.mxu3 %v391_v31 }
 0x1d2   :  { %656 = vmatmul.bf16.gmra.mxu0 %v390_v33  ;;  %680 = vmatmul.bf16.gmra.mxu1 %v391_v31 }
 0x22f   :  { %v647_v55 = vpop.f32.mrf.mxu0  ;;  %v671_v34 = vpop.f32.mrf.mxu1 }
 0x230   :  { %v648_v35 = vadd.f32 %v647_v55, %v427_v51 }
 0x232   :  { %v672_v38 = vadd.f32 %v671_v34, %v648_v35 }
 0x234   :  { %v599_v3 = vpop.f32.mrf.mxu2  ;;  %v623_v36 = vpop.f32.mrf.mxu3 }
 0x235   :  { %v600_v37 = vadd.f32 %v599_v3, %v426_v61 }
 0x237   :  { %v624_v39 = vadd.f32 %v623_v36, %v600_v37  ;;  %v649_v40 = vpop.f32.mrf.mxu0  ;;  %v673_v41 = vpop.f32.mrf.mxu1 }
 0x238   :  { %v650_v43 = vadd.f32 %v649_v40, %v427_v51  ;;  %v1508_v40 = vld [vmem:[#allocation5 + $0x78] sm:$0xff] }
 0x239   :  { %v688_v42 = vadd.f32 %v672_v38, %v624_v39  ;;  %1046 = vmatpush.bf16.msrb.mxu3 %v1508_v40 }
 0x23a   :  { %v674_v47 = vadd.f32 %v673_v41, %v650_v43  ;;  %v1499_v43 = vld [vmem:[#allocation5 + $0x30] sm:$0xff] }
 0x23b   :  { %689 = vadd.xlane.f32.xlu0 %v688_v42 }
 0x23c   :  { %v601_v44 = vpop.f32.mrf.mxu2  ;;  %v625_v45 = vpop.f32.mrf.mxu3 }
 0x23d   :  { %v602_v46 = vadd.f32 %v601_v44, %v426_v61 }
 0x23f   :  { %v626_v48 = vadd.f32 %v625_v45, %v602_v46  ;;  %v652_v10 = vpop.f32.mrf.mxu0  ;;  %v676_v11 = vpop.f32.mrf.mxu1 }
 0x240   :  { %v653_v50 = vadd.f32 %v652_v10, %v427_v51 }
 0x241   :  { %v691_v49 = vadd.f32 %v674_v47, %v626_v48 }
 0x242   :  { %v677_v59 = vadd.f32 %v676_v11, %v653_v50 }
 0x243   :  { %692 = vadd.xlane.f32.xlu1 %v691_v49 }
 0x244   :  { %v604_v52 = vpop.f32.mrf.mxu2  ;;  %v628_v53 = vpop.f32.mrf.mxu3 }
 0x245   :  { %v605_v56 = vadd.f32 %v604_v52, %v426_v61 }
 0x247   :  { %v629_v60 = vadd.f32 %v628_v53, %v605_v56  ;;  %v654_v62 = vpop.f32.mrf.mxu0  ;;  %v678_v63 = vpop.f32.mrf.mxu1 }
 0x248   :  { %v655_v17 = vadd.f32 %v654_v62, %v427_v51 }
 0x249   :  { %v694_v2 = vadd.f32 %v677_v59, %v629_v60 }
 0x24a   :  { %v679_v4 = vadd.f32 %v678_v63, %v655_v17 }
 0x24b   :  { %695 = vadd.xlane.f32.xlu2 %v694_v2 }
 0x24c   :  { %v606_v18 = vpop.f32.mrf.mxu2  ;;  %v630_v57 = vpop.f32.mrf.mxu3 }
 0x24d   :  { %v607_v58 = vadd.f32 %v606_v18, %v426_v61 }
 0x24f   :  { %v631_v5 = vadd.f32 %v630_v57, %v607_v58  ;;  %v657_v6 = vpop.f32.mrf.mxu0  ;;  %v681_v9 = vpop.f32.mrf.mxu1 }
 0x250   :  { %v658_v8 = vadd.f32 %v657_v6, %v427_v51 }
 0x251   :  { %v697_v7 = vadd.f32 %v679_v4, %v631_v5 }
 0x252   :  { %v682_v15 = vadd.f32 %v681_v9, %v658_v8  ;;  %v1498_v8 = vld [vmem:[#allocation5 + $0x28] sm:$0xff] }
 0x253   :  { %698 = vadd.xlane.f32.xlu0 %v697_v7  ;;  %v1507_v7 = vld [vmem:[#allocation5 + $0x70] sm:$0xff]  ;;  %v1506_v9 = vld [vmem:[#allocation5 + $0x68] sm:$0xff] }
 0x254   :  { %v609_v12 = vpop.f32.mrf.mxu2  ;;  %v633_v13 = vpop.f32.mrf.mxu3  ;;  %1047 = vmatpush.bf16.msrb.mxu3 %v1507_v7 }
 0x255   :  { %v610_v14 = vadd.f32 %v609_v12, %v426_v61  ;;  %v1497_v12 = vld [vmem:[#allocation5 + $0x20] sm:$0xff] }
 0x257   :  { %v634_v16 = vadd.f32 %v633_v13, %v610_v14  ;;  %v659_v19 = vpop.f32.mrf.mxu0  ;;  %v683_v25 = vpop.f32.mrf.mxu1  ;;  %v1505_v13 = vld [vmem:[#allocation5 + $0x60] sm:$0xff]  ;;  %v1496_v14 = vld [vmem:[#allocation5 + $0x18] sm:$0xff] }
 0x258   :  { %v660_v0 = vadd.f32 %v659_v19, %v427_v51  ;;  %1048 = vmatpush.bf16.msrb.mxu3 %v1506_v9  ;;  %v1503_v19 = vld [vmem:[#allocation5 + $0x50] sm:$0xff] }
 0x259   :  { %v700_v20 = vadd.f32 %v682_v15, %v634_v16 }
 0x25a   :  { %v684_v22 = vadd.f32 %v683_v25, %v660_v0 }
 0x25b   :  { %701 = vadd.xlane.f32.xlu1 %v700_v20 }
 0x25c   :  { %v611_v1 = vpop.f32.mrf.mxu2  ;;  %v635_v21 = vpop.f32.mrf.mxu3  ;;  %1049 = vmatpush.bf16.msrb.mxu3 %v1505_v13 }
 0x25d   :  { %v612_v24 = vadd.f32 %v611_v1, %v426_v61  ;;  %v1494_v1 = vld [vmem:[#allocation5 + $0x8] sm:$0xff] }
 0x25f   :  { %v636_v23 = vadd.f32 %v635_v21, %v612_v24  ;;  %v1502_v24 = vld [vmem:[#allocation5 + $0x48] sm:$0xff]  ;;  %v1493_v21 = vld [vmem:[#allocation5] sm:$0xff] }
 0x261   :  { %v703_v26 = vadd.f32 %v684_v22, %v636_v23 }
 0x263   :  { %704 = vadd.xlane.f32.xlu2 %v703_v26 }
 0x2ae   :  { %v690_v27 = vpop.xlane.xlu0 %689 }
 0x2af   :  { %v706_v28 = vmul.f32 %v690_v27, %v1759_v54 }
 0x2b1   :  { %v1875_v29 = vsub.f32 %v624_v39, %v706_v28  ;;  %v1877_v30 = vsub.f32 %v672_v38, %v706_v28  ;;  %v1500_v39 = vld [vmem:[#allocation5 + $0x38] sm:$0xff] }
 0x2b2   :  { %1022 = vmatpush.bf16.msrb.mxu2 %v1500_v39  ;;  %v686_v39 = vld [vmem:[%s2020_s7] sm:$0x3] }
 0x2b3   :  { %v724_v33 = vmul.f32 %v1875_v29, %v1875_v29  ;;  %v725_v31 = vmul.f32 %v1877_v30, %v1877_v30 }
 0x2b5   :  { %v736_v32 = vadd.f32 %v725_v31, %v724_v33 }
 0x2b6   :  { %v693_v51 = vpop.xlane.xlu1 %692  ;;  %1023 = vmatpush.bf16.msrb.mxu2 %v1499_v43 }
 0x2b7   :  { %v707_v55 = vmul.f32 %v693_v51, %v1759_v54  ;;  %737 = vadd.xlane.f32.xlu0 %v736_v32 }
 0x2b9   :  { %v1884_v34 = vsub.f32 %v626_v48, %v707_v55  ;;  %v1886_v61 = vsub.f32 %v674_v47, %v707_v55 }
 0x2ba   :  { %1024 = vmatpush.bf16.msrb.mxu2 %v1498_v8 }
 0x2bb   :  { %v726_v35 = vmul.f32 %v1884_v34, %v1884_v34  ;;  %v727_v3 = vmul.f32 %v1886_v61, %v1886_v61 }
 0x2bd   :  { %v739_v36 = vadd.f32 %v727_v3, %v726_v35 }
 0x2be   :  { %v696_v37 = vpop.xlane.xlu2 %695  ;;  %1025 = vmatpush.bf16.msrb.mxu2 %v1497_v12 }
 0x2bf   :  { %v708_v38 = vmul.f32 %v696_v37, %v1759_v54  ;;  %740 = vadd.xlane.f32.xlu1 %v739_v36 }
 0x2c1   :  { %v1893_v41 = vsub.f32 %v629_v60, %v708_v38  ;;  %v1895_v42 = vsub.f32 %v677_v59, %v708_v38 }
 0x2c2   :  { %1026 = vmatpush.bf16.msrb.mxu2 %v1496_v14 }
 0x2c3   :  { %v728_v44 = vmul.f32 %v1893_v41, %v1893_v41  ;;  %v729_v45 = vmul.f32 %v1895_v42, %v1895_v42 }
 0x2c5   :  { %v742_v46 = vadd.f32 %v729_v45, %v728_v44 }
 0x2c6   :  { %v699_v47 = vpop.xlane.xlu0 %698 }
 0x2c7   :  { %v709_v48 = vmul.f32 %v699_v47, %v1759_v54  ;;  %743 = vadd.xlane.f32.xlu2 %v742_v46  ;;  %v687_v47 = vld [vmem:[%s2021_s8] sm:$0x3] }
 0x2c9   :  { %v1902_v10 = vsub.f32 %v631_v5, %v709_v48  ;;  %v1904_v11 = vsub.f32 %v679_v4, %v709_v48  ;;  %v1938_v48 = vperm.slane %v686_v39, 0 }
 0x2cb   :  { %v730_v49 = vmul.f32 %v1902_v10, %v1902_v10  ;;  %v731_v50 = vmul.f32 %v1904_v11, %v1904_v11 }
 0x2cd   :  { %v745_v52 = vadd.f32 %v731_v50, %v730_v49 }
 0x2ce   :  { %v702_v53 = vpop.xlane.xlu1 %701 }
 0x2cf   :  { %v710_v56 = vmul.f32 %v702_v53, %v1759_v54  ;;  %746 = vadd.xlane.f32.xlu0 %v745_v52  ;;  %v1942_v52 = vperm.slane %v686_v39, 1 }
 0x2d1   :  { %v1911_v59 = vsub.f32 %v634_v16, %v710_v56  ;;  %v1913_v60 = vsub.f32 %v682_v15, %v710_v56  ;;  %v1504_v15 = vld [vmem:[#allocation5 + $0x58] sm:$0xff]  ;;  %v1495_v16 = vld [vmem:[#allocation5 + $0x10] sm:$0xff] }
 0x2d2   :  { %1050 = vmatpush.bf16.msrb.mxu3 %v1504_v15  ;;  %1027 = vmatpush.bf16.msrb.mxu2 %v1495_v16 }
 0x2d3   :  { %v732_v62 = vmul.f32 %v1911_v59, %v1911_v59  ;;  %v733_v63 = vmul.f32 %v1913_v60, %v1913_v60 }
 0x2d5   :  { %v748_v2 = vadd.f32 %v733_v63, %v732_v62  ;;  %v1944_v63 = vperm.slane %v687_v47, 0 }
 0x2d6   :  { %v705_v17 = vpop.xlane.xlu2 %704  ;;  %1051 = vmatpush.bf16.msrb.mxu3 %v1503_v19  ;;  %1028 = vmatpush.bf16.msrb.mxu2 %v1494_v1 }
 0x2d7   :  { %v711_v18 = vmul.f32 %v705_v17, %v1759_v54  ;;  %749 = vadd.xlane.f32.xlu1 %v748_v2 }
 0x2d9   :  { %v1920_v57 = vsub.f32 %v636_v23, %v711_v18  ;;  %v1922_v58 = vsub.f32 %v684_v22, %v711_v18  ;;  %v1501_v22 = vld [vmem:[#allocation5 + $0x40] sm:$0xff] }
 0x2da   :  { %1052 = vmatpush.bf16.msrb.mxu3 %v1502_v24  ;;  %1029 = vmatpush.bf16.msrb.mxu2 %v1493_v21 }
 0x2db   :  { %v734_v4 = vmul.f32 %v1920_v57, %v1920_v57  ;;  %v735_v5 = vmul.f32 %v1922_v58, %v1922_v58 }
 0x2dd   :  { %v751_v6 = vadd.f32 %v735_v5, %v734_v4 }
 0x2de   :  { %1053 = vmatpush.bf16.msrb.mxu3 %v1501_v22 }
 0x2df   :  { %752 = vadd.xlane.f32.xlu2 %v751_v6 }
 0x32a   :  { %v738_v20 = vpop.xlane.xlu0 %737 }
 0x32b   :  { %v754_v0 = vmul.f32 %v738_v20, %v1759_v54 }
 0x32d   :  { %v760_v25 = vadd.f32 1e-05, %v754_v0 }
 0x32f   :  { %1532 = vrsqrt.f32 %v760_v25  ;;  %vm772_vm5 = vweird.f32 %v760_v25 }
 0x332   :  { %v741_v23 = vpop.xlane.xlu1 %740 }
 0x333   :  { %v755_v26 = vmul.f32 %v741_v23, %v1759_v54 }
 0x335   :  { %v1533_v27 = vpop.eup %1532  ;;  %v761_v28 = vadd.f32 1e-05, %v755_v26 }
 0x336   :  { %v767_v33 = vmul.f32 %v1533_v27, %v760_v25  ;;  %vm773_vm4 = vweird.f32 %v1533_v27 }
 0x337   :  { %1534 = vrsqrt.f32 %v761_v28  ;;  %vm774_vm6 = vmor %vm772_vm5, %vm773_vm4  ;;  %vm782_vm8 = vweird.f32 %v761_v28 }
 0x338   :  { %v768_v31 = vmul.f32 %v1533_v27, %v767_v33 }
 0x33a   :  { %v769_v32 = vmul.f32 0.5, %v768_v31  ;;  %v744_v51 = vpop.xlane.xlu2 %743 }
 0x33b   :  { %v756_v55 = vmul.f32 %v744_v51, %v1759_v54 }
 0x33c   :  { %v770_v35 = vsub.f32 1.5, %v769_v32 }
 0x33d   :  { %v1535_v3 = vpop.eup %1534  ;;  %v762_v36 = vadd.f32 1e-05, %v756_v55 }
 0x33e   :  { %v771_v37 = vmul.f32 %v1533_v27, %v770_v35  ;;  %v777_v38 = vmul.f32 %v1535_v3, %v761_v28  ;;  %vm783_vm7 = vweird.f32 %v1535_v3 }
 0x33f   :  { %1536 = vrsqrt.f32 %v762_v36  ;;  %vm784_vm9 = vmor %vm782_vm8, %vm783_vm7  ;;  %vm792_vm11 = vweird.f32 %v762_v36 }
 0x340   :  { %v775_v40 = vsel %vm774_vm6, %v1533_v27, %v771_v37  ;;  %v778_v43 = vmul.f32 %v1535_v3, %v777_v38 }
 0x341   :  { %v826_v44 = vmul.f32 %v775_v40, %v1875_v29  ;;  %v827_v49 = vmul.f32 %v775_v40, %v1877_v30  ;;  %v1948_v30 = vperm.slane %v687_v47, 1 }
 0x342   :  { %v779_v45 = vmul.f32 0.5, %v778_v43  ;;  %v747_v46 = vpop.xlane.xlu0 %746 }
 0x343   :  { %v757_v50 = vmul.f32 %v747_v46, %v1759_v54  ;;  %v843_v17 = vmul.f32 %v1938_v48, %v826_v44  ;;  %v844_v18 = vmul.f32 %v1942_v52, %v827_v49 }
 0x344   :  { %v780_v53 = vsub.f32 1.5, %v779_v45 }
 0x345   :  { %v1537_v56 = vpop.eup %1536  ;;  %v763_v62 = vadd.f32 1e-05, %v757_v50  ;;  %v860_v12 = vadd.f32 %v1944_v63, %v843_v17  ;;  %v861_v16 = vadd.f32 %v1948_v30, %v844_v18 }
 0x346   :  { %v781_v29 = vmul.f32 %v1535_v3, %v780_v53  ;;  %v787_v2 = vmul.f32 %v1537_v56, %v762_v36  ;;  %vm793_vm10 = vweird.f32 %v1537_v56 }
 0x347   :  { %1538 = vrsqrt.f32 %v763_v62  ;;  %v872_v25 = vmax.f32 %v860_v12, 0.0  ;;  %vm794_vm12 = vmor %vm792_vm11, %vm793_vm10  ;;  %v873_v22 = vmax.f32 %v861_v16, 0.0  ;;  %vm802_vm14 = vweird.f32 %v763_v62 }
 0x348   :  { %v785_v4 = vsel %vm784_vm9, %v1535_v3, %v781_v29  ;;  %v788_v5 = vmul.f32 %v1537_v56, %v787_v2 }
 0x349   :  { %v828_v6 = vmul.f32 %v785_v4, %v1884_v34  ;;  %v829_v7 = vmul.f32 %v785_v4, %v1886_v61 }
 0x34a   :  { %v789_v8 = vmul.f32 0.5, %v788_v5  ;;  %v750_v9 = vpop.xlane.xlu1 %749 }
 0x34b   :  { %v758_v13 = vmul.f32 %v750_v9, %v1759_v54  ;;  %v845_v14 = vmul.f32 %v1938_v48, %v828_v6  ;;  %v846_v15 = vmul.f32 %v1942_v52, %v829_v7 }
 0x34c   :  { %v790_v19 = vsub.f32 1.5, %v789_v8 }
 0x34d   :  { %v1539_v20 = vpop.eup %1538  ;;  %v764_v0 = vadd.f32 1e-05, %v758_v13  ;;  %v862_v34 = vadd.f32 %v1944_v63, %v845_v14  ;;  %v863_v61 = vadd.f32 %v1948_v30, %v846_v15 }
 0x34e   :  { %v791_v1 = vmul.f32 %v1537_v56, %v790_v19  ;;  %v797_v24 = vmul.f32 %v1539_v20, %v763_v62  ;;  %vm803_vm13 = vweird.f32 %v1539_v20 }
 0x34f   :  { %1540 = vrsqrt.f32 %v764_v0  ;;  %v874_v21 = vmax.f32 %v862_v34, 0.0  ;;  %v875_v23 = vmax.f32 %v863_v61, 0.0  ;;  %vm804_vm15 = vmor %vm802_vm14, %vm803_vm13  ;;  %vm812_vm1 = vweird.f32 %v764_v0 }
 0x350   :  { %v795_v26 = vsel %vm794_vm12, %v1537_v56, %v791_v1  ;;  %v798_v27 = vmul.f32 %v1539_v20, %v797_v24 }
 0x351   :  { %v884_v28 = vpack.c.bf16 %v874_v21, %v872_v25  ;;  %v885_v33 = vpack.c.bf16 %v875_v23, %v873_v22  ;;  %v830_v55 = vmul.f32 %v795_v26, %v1893_v41  ;;  %v831_v35 = vmul.f32 %v795_v26, %v1895_v42 }
 0x352   :  { %v799_v31 = vmul.f32 0.5, %v798_v27  ;;  %v753_v32 = vpop.xlane.xlu2 %752 }
 0x353   :  { %v759_v51 = vmul.f32 %v753_v32, %v1759_v54  ;;  %1030 = vmatmul.bf16.vlgmr.msrb.gmra.mxu2 %v884_v28  ;;  %1054 = vmatmul.bf16.vlgmr.msrb.gmra.mxu3 %v885_v33  ;;  %v847_v40 = vmul.f32 %v1938_v48, %v830_v55  ;;  %v848_v43 = vmul.f32 %v1942_v52, %v831_v35 }
 0x354   :  { %v800_v3 = vsub.f32 1.5, %v799_v31 }
 0x355   :  { %v1541_v36 = vpop.eup %1540  ;;  %v765_v37 = vadd.f32 1e-05, %v759_v51  ;;  %v864_v47 = vadd.f32 %v1944_v63, %v847_v40  ;;  %v865_v50 = vadd.f32 %v1948_v30, %v848_v43 }
 0x356   :  { %v801_v38 = vmul.f32 %v1539_v20, %v800_v3  ;;  %v807_v39 = vmul.f32 %v1541_v36, %v764_v0  ;;  %vm813_vm0 = vweird.f32 %v1541_v36 }
 0x357   :  { %1542 = vrsqrt.f32 %v765_v37  ;;  %vm814_vm2 = vmor %vm812_vm1, %vm813_vm0  ;;  %v877_v18 = vmax.f32 %v865_v50, 0.0  ;;  %vm822_vm4 = vweird.f32 %v765_v37 }
 0x358   :  { %v805_v54 = vsel %vm804_vm15, %v1539_v20, %v801_v38  ;;  %v808_v44 = vmul.f32 %v1541_v36, %v807_v39 }
 0x359   :  { %v832_v45 = vmul.f32 %v805_v54, %v1902_v10  ;;  %v833_v41 = vmul.f32 %v805_v54, %v1904_v11  ;;  %v876_v11 = vmax.f32 %v864_v47, 0.0 }
 0x35a   :  { %v809_v42 = vmul.f32 0.5, %v808_v44 }
 0x35b   :  { %v849_v46 = vmul.f32 %v1938_v48, %v832_v45  ;;  %v850_v49 = vmul.f32 %v1942_v52, %v833_v41 }
 0x35c   :  { %v810_v53 = vsub.f32 1.5, %v809_v42 }
 0x35d   :  { %v1543_v56 = vpop.eup %1542  ;;  %v866_v62 = vadd.f32 %v1944_v63, %v849_v46  ;;  %v867_v29 = vadd.f32 %v1948_v30, %v850_v49 }
 0x35e   :  { %v811_v2 = vmul.f32 %v1541_v36, %v810_v53  ;;  %v817_v10 = vmul.f32 %v1543_v56, %v765_v37  ;;  %vm823_vm3 = vweird.f32 %v1543_v56 }
 0x35f   :  { %v878_v17 = vmax.f32 %v866_v62, 0.0  ;;  %v879_v4 = vmax.f32 %v867_v29, 0.0  ;;  %vm824_vm5 = vmor %vm822_vm4, %vm823_vm3 }
 0x360   :  { %v815_v5 = vsel %vm814_vm2, %v1541_v36, %v811_v2  ;;  %v818_v6 = vmul.f32 %v1543_v56, %v817_v10 }
 0x361   :  { %v886_v7 = vpack.c.bf16 %v878_v17, %v876_v11  ;;  %v887_v8 = vpack.c.bf16 %v879_v4, %v877_v18  ;;  %v834_v12 = vmul.f32 %v815_v5, %v1911_v59  ;;  %v835_v13 = vmul.f32 %v815_v5, %v1913_v60 }
 0x362   :  { %v819_v9 = vmul.f32 0.5, %v818_v6 }
 0x363   :  { %1035 = vmatmul.bf16.gmra.mxu2 %v886_v7  ;;  %1059 = vmatmul.bf16.gmra.mxu3 %v887_v8  ;;  %v851_v16 = vmul.f32 %v1938_v48, %v834_v12  ;;  %v852_v19 = vmul.f32 %v1942_v52, %v835_v13 }
 0x364   :  { %v820_v14 = vsub.f32 1.5, %v819_v9 }
 0x365   :  { %v868_v59 = vadd.f32 %v1944_v63, %v851_v16  ;;  %v869_v1 = vadd.f32 %v1948_v30, %v852_v19 }
 0x366   :  { %v821_v15 = vmul.f32 %v1543_v56, %v820_v14 }
 0x367   :  { %v880_v21 = vmax.f32 %v868_v59, 0.0  ;;  %v881_v23 = vmax.f32 %v869_v1, 0.0 }
 0x368   :  { %v825_v20 = vsel %vm824_vm5, %v1543_v56, %v821_v15 }
 0x369   :  { %v836_v0 = vmul.f32 %v825_v20, %v1920_v57  ;;  %v837_v34 = vmul.f32 %v825_v20, %v1922_v58  ;;  %v1517_v58 = vld [vmem:[%s2023_s10] ss:$0 sm:$0xff]  ;;  %s1653_s10 = smov [#allocation7]  }
 0x36a   :  { %s1212_s19 = sshll.u32 %s1653_s10, 4  ;;  %s1213_s19 = int_to_ptr.vmem [resolvable:$true] %s1212_s19 }
 0x36b   :  { %v853_v61 = vmul.f32 %v1938_v48, %v836_v0  ;;  %v854_v60 = vmul.f32 %v1942_v52, %v837_v34 }
 0x36d   :  { %v870_v24 = vadd.f32 %v1944_v63, %v853_v61  ;;  %v871_v25 = vadd.f32 %v1948_v30, %v854_v60 }
 0x36f   :  { %v882_v22 = vmax.f32 %v870_v24, 0.0  ;;  %v883_v26 = vmax.f32 %v871_v25, 0.0 }
 0x371   :  { %v888_v27 = vpack.c.bf16 %v882_v22, %v880_v21  ;;  %v889_v57 = vpack.c.bf16 %v883_v26, %v881_v23 }
 0x373   :  { %1040 = vmatmul.bf16.gmra.mxu2 %v888_v27  ;;  %1064 = vmatmul.bf16.gmra.mxu3 %v889_v57 }
 0x3d6   :  { %v1031_v48 = vpop.f32.mrf.mxu2  ;;  %v1055_v52 = vpop.f32.mrf.mxu3 }
 0x3d7   :  { %v1032_v28 = vadd.f32 %v1517_v58, %v1031_v48 }
 0x3d9   :  { %v1056_v33 = vadd.f32 %v1055_v52, %v1032_v28 }
 0x3db   :  { %1070 = vmax.xlane.f32.xlu0 %v1056_v33 }
 0x3de   :  { %v1033_v63 = vpop.f32.mrf.mxu2  ;;  %v1057_v31 = vpop.f32.mrf.mxu3 }
 0x3df   :  { %v1034_v30 = vadd.f32 %v1517_v58, %v1033_v63 }
 0x3e1   :  { %v1058_v32 = vadd.f32 %v1057_v31, %v1034_v30 }
 0x3e3   :  { %1072 = vmax.xlane.f32.xlu1 %v1058_v32 }
 0x3e6   :  { %v1036_v51 = vpop.f32.mrf.mxu2  ;;  %v1060_v55 = vpop.f32.mrf.mxu3 }
 0x3e7   :  { %v1037_v35 = vadd.f32 %v1517_v58, %v1036_v51 }
 0x3e9   :  { %v1061_v3 = vadd.f32 %v1060_v55, %v1037_v35 }
 0x3eb   :  { %1074 = vmax.xlane.f32.xlu2 %v1061_v3 }
 0x3ee   :  { %v1038_v36 = vpop.f32.mrf.mxu2  ;;  %v1062_v37 = vpop.f32.mrf.mxu3 }
 0x3ef   :  { %v1039_v38 = vadd.f32 %v1517_v58, %v1038_v36 }
 0x3f1   :  { %v1063_v39 = vadd.f32 %v1062_v37, %v1039_v38 }
 0x3f3   :  { %1076 = vmax.xlane.f32.xlu0 %v1063_v39 }
 0x3f6   :  { %v1041_v40 = vpop.f32.mrf.mxu2  ;;  %v1065_v43 = vpop.f32.mrf.mxu3 }
 0x3f7   :  { %v1042_v54 = vadd.f32 %v1517_v58, %v1041_v40 }
 0x3f9   :  { %v1066_v44 = vadd.f32 %v1065_v43, %v1042_v54 }
 0x3fb   :  { %1078 = vmax.xlane.f32.xlu1 %v1066_v44 }
 0x3fe   :  { %v1043_v45 = vpop.f32.mrf.mxu2  ;;  %v1067_v42 = vpop.f32.mrf.mxu3 }
 0x3ff   :  { %v1044_v41 = vadd.f32 %v1517_v58, %v1043_v45 }
 0x401   :  { %v1068_v46 = vadd.f32 %v1067_v42, %v1044_v41 }
 0x403   :  { %1080 = vmax.xlane.f32.xlu2 %v1068_v46 }
 0x44e   :  { %v1071_v47 = vpop.xlane.xlu0 %1070 }
 0x44f   :  { %v1082_v49 = vsub.f32 %v1056_v33, %v1071_v47 }
 0x451   :  { %v1088_v50 = vmul.f32 1.442695, %v1082_v49 }
 0x453   :  { %1544 = vpow2.f32 %v1088_v50 }
 0x456   :  { %v1073_v53 = vpop.xlane.xlu1 %1072 }
 0x457   :  { %v1083_v56 = vsub.f32 %v1058_v32, %v1073_v53 }
 0x459   :  { %v1545_v62 = vpop.eup %1544  ;;  %v1090_v29 = vmul.f32 1.442695, %v1083_v56 }
 0x45a   :  { %1100 = vadd.xlane.f32.xlu0 %v1545_v62 }
 0x45b   :  { %1546 = vpow2.f32 %v1090_v29 }
 0x45e   :  { %v1075_v2 = vpop.xlane.xlu2 %1074 }
 0x45f   :  { %v1084_v10 = vsub.f32 %v1061_v3, %v1075_v2 }
 0x461   :  { %v1987_v11 = vpop.eup %1546  ;;  %v1092_v17 = vmul.f32 1.442695, %v1084_v10 }
 0x462   :  { %1102 = vadd.xlane.f32.xlu1 %v1987_v11 }
 0x463   :  { %1548 = vpow2.f32 %v1092_v17 }
 0x466   :  { %v1077_v18 = vpop.xlane.xlu0 %1076 }
 0x467   :  { %v1085_v4 = vsub.f32 %v1063_v39, %v1077_v18 }
 0x469   :  { %v1990_v5 = vpop.eup %1548  ;;  %v1094_v6 = vmul.f32 1.442695, %v1085_v4 }
 0x46a   :  { %1104 = vadd.xlane.f32.xlu2 %v1990_v5 }
 0x46b   :  { %1550 = vpow2.f32 %v1094_v6 }
 0x46e   :  { %v1079_v7 = vpop.xlane.xlu1 %1078 }
 0x46f   :  { %v1086_v8 = vsub.f32 %v1066_v44, %v1079_v7 }
 0x471   :  { %v1993_v9 = vpop.eup %1550  ;;  %v1096_v12 = vmul.f32 1.442695, %v1086_v8 }
 0x472   :  { %1106 = vadd.xlane.f32.xlu0 %v1993_v9 }
 0x473   :  { %1552 = vpow2.f32 %v1096_v12 }
 0x476   :  { %v1081_v13 = vpop.xlane.xlu2 %1080 }
 0x477   :  { %v1087_v14 = vsub.f32 %v1068_v46, %v1081_v13 }
 0x479   :  { %v1996_v15 = vpop.eup %1552  ;;  %v1098_v16 = vmul.f32 1.442695, %v1087_v14 }
 0x47a   :  { %1108 = vadd.xlane.f32.xlu1 %v1996_v15 }
 0x47b   :  { %1554 = vpow2.f32 %v1098_v16 }
 0x481   :  { %v1999_v19 = vpop.eup %1554 }
 0x482   :  { %1110 = vadd.xlane.f32.xlu2 %v1999_v19 }
 0x4cd   :  { %v1101_v20 = vpop.xlane.xlu0 %1100 }
 0x4ce   :  { %1556 = vrcp.f32 %v1101_v20  ;;  %v1123_v60 = vand.u32 2147483648, %v1101_v20  ;;  %v1121_v24 = vand.u32 2147483647, %v1101_v20  ;;  %vm1117_vm7 = vweird.f32 %v1101_v20 }
 0x4d0   :  { %v1124_v22 = vor.u32 1.1754944e-38, %v1123_v60  ;;  %vm1122_vm9 = vcmp.eq.f32.partialorder %v1121_v24, 8.507059e+37 }
 0x4d4   :  { %v1557_v0 = vpop.eup %1556 }
 0x4d5   :  { %v1113_v34 = vmul.f32 %v1557_v0, %v1101_v20  ;;  %v1103_v61 = vpop.xlane.xlu1 %1102  ;;  %vm1118_vm6 = vweird.f32 %v1557_v0 }
 0x4d6   :  { %1558 = vrcp.f32 %v1103_v61  ;;  %vm1119_vm8 = vmor %vm1117_vm7, %vm1118_vm6  ;;  %v1138_v52 = vand.u32 2147483648, %v1103_v61  ;;  %v1136_v33 = vand.u32 2147483647, %v1103_v61  ;;  %vm1132_vm11 = vweird.f32 %v1103_v61 }
 0x4d7   :  { %v1114_v59 = vsub.f32 1.0, %v1113_v34 }
 0x4d8   :  { %v1139_v30 = vor.u32 1.1754944e-38, %v1138_v52  ;;  %vm1137_vm13 = vcmp.eq.f32.partialorder %v1136_v33, 8.507059e+37 }
 0x4d9   :  { %v1115_v1 = vmul.f32 %v1557_v0, %v1114_v59 }
 0x4db   :  { %v1116_v25 = vadd.f32 %v1557_v0, %v1115_v1 }
 0x4dc   :  { %v1559_v21 = vpop.eup %1558 }
 0x4dd   :  { %v1120_v23 = vsel %vm1119_vm8, %v1557_v0, %v1116_v25  ;;  %v1128_v26 = vmul.f32 %v1559_v21, %v1103_v61  ;;  %v1105_v27 = vpop.xlane.xlu2 %1104  ;;  %vm1133_vm10 = vweird.f32 %v1559_v21 }
 0x4de   :  { %v1125_v57 = vsel %vm1122_vm9, %v1124_v22, %v1120_v23  ;;  %1560 = vrcp.f32 %v1105_v27  ;;  %vm1134_vm12 = vmor %vm1132_vm11, %vm1133_vm10  ;;  %v1153_v37 = vand.u32 2147483648, %v1105_v27  ;;  %v1151_v39 = vand.u32 2147483647, %v1105_v27 }
 0x4df   :  { %v1126_v58 = vmul.f32 %v1545_v62, %v1125_v57  ;;  %v1129_v48 = vsub.f32 1.0, %v1128_v26  ;;  %vm1147_vm15 = vweird.f32 %v1105_v27 }
 0x4e0   :  { %v1154_v54 = vor.u32 1.1754944e-38, %v1153_v37  ;;  %vm1152_vm1 = vcmp.eq.f32.partialorder %v1151_v39, 8.507059e+37 }
 0x4e1   :  { %1202 = vst [vmem:[#allocation7] sm:$0xff] %v1126_v58  ;;  %v1130_v28 = vmul.f32 %v1559_v21, %v1129_v48 }
 0x4e3   :  { %v1131_v63 = vadd.f32 %v1559_v21, %v1130_v28 }
 0x4e4   :  { %v1561_v31 = vpop.eup %1560 }
 0x4e5   :  { %v1135_v32 = vsel %vm1134_vm12, %v1559_v21, %v1131_v63  ;;  %v1143_v51 = vmul.f32 %v1561_v31, %v1105_v27  ;;  %v1107_v55 = vpop.xlane.xlu0 %1106  ;;  %vm1148_vm14 = vweird.f32 %v1561_v31 }
 0x4e6   :  { %v1140_v35 = vsel %vm1137_vm13, %v1139_v30, %v1135_v32  ;;  %1562 = vrcp.f32 %v1107_v55  ;;  %vm1149_vm0 = vmor %vm1147_vm15, %vm1148_vm14  ;;  %v1168_v49 = vand.u32 2147483648, %v1107_v55  ;;  %v1166_v53 = vand.u32 2147483647, %v1107_v55 }
 0x4e7   :  { %v1141_v3 = vmul.f32 %v1987_v11, %v1140_v35  ;;  %v1144_v36 = vsub.f32 1.0, %v1143_v51  ;;  %vm1162_vm3 = vweird.f32 %v1107_v55 }
 0x4e8   :  { %v1169_v29 = vor.u32 1.1754944e-38, %v1168_v49  ;;  %vm1167_vm5 = vcmp.eq.f32.partialorder %v1166_v53, 8.507059e+37 }
 0x4e9   :  { %1203 = vst [vmem:[#allocation7 + $0x8] sm:$0xff] %v1141_v3  ;;  %v1145_v38 = vmul.f32 %v1561_v31, %v1144_v36 }
 0x4eb   :  { %v1146_v40 = vadd.f32 %v1561_v31, %v1145_v38 }
 0x4ec   :  { %v1563_v43 = vpop.eup %1562 }
 0x4ed   :  { %v1150_v44 = vsel %vm1149_vm0, %v1561_v31, %v1146_v40  ;;  %v1158_v45 = vmul.f32 %v1563_v43, %v1107_v55  ;;  %v1109_v41 = vpop.xlane.xlu1 %1108  ;;  %vm1163_vm2 = vweird.f32 %v1563_v43 }
 0x4ee   :  { %v1155_v42 = vsel %vm1152_vm1, %v1154_v54, %v1150_v44  ;;  %1564 = vrcp.f32 %v1109_v41  ;;  %vm1164_vm4 = vmor %vm1162_vm3, %vm1163_vm2  ;;  %v1181_v7 = vand.u32 2147483647, %v1109_v41  ;;  %vm1177_vm7 = vweird.f32 %v1109_v41 }
 0x4ef   :  { %v1156_v46 = vmul.f32 %v1990_v5, %v1155_v42  ;;  %v1159_v47 = vsub.f32 1.0, %v1158_v45  ;;  %v1183_v5 = vand.u32 2147483648, %v1109_v41 }
 0x4f0   :  { %vm1182_vm9 = vcmp.eq.f32.partialorder %v1181_v7, 8.507059e+37 }
 0x4f1   :  { %1204 = vst [vmem:[#allocation7 + $0x10] sm:$0xff] %v1156_v46  ;;  %v1160_v50 = vmul.f32 %v1563_v43, %v1159_v47  ;;  %v1184_v13 = vor.u32 1.1754944e-38, %v1183_v5 }
 0x4f3   :  { %v1161_v56 = vadd.f32 %v1563_v43, %v1160_v50 }
 0x4f4   :  { %v1565_v62 = vpop.eup %1564 }
 0x4f5   :  { %v1165_v2 = vsel %vm1164_vm4, %v1563_v43, %v1161_v56  ;;  %v1173_v10 = vmul.f32 %v1565_v62, %v1109_v41  ;;  %v1111_v11 = vpop.xlane.xlu2 %1110  ;;  %vm1178_vm6 = vweird.f32 %v1565_v62 }
 0x4f6   :  { %v1170_v17 = vsel %vm1167_vm5, %v1169_v29, %v1165_v2  ;;  %1566 = vrcp.f32 %v1111_v11  ;;  %vm1179_vm8 = vmor %vm1177_vm7, %vm1178_vm6  ;;  %v1198_v61 = vand.u32 2147483648, %v1111_v11  ;;  %v1196_v59 = vand.u32 2147483647, %v1111_v11 }
 0x4f7   :  { %v1171_v18 = vmul.f32 %v1993_v9, %v1170_v17  ;;  %v1174_v4 = vsub.f32 1.0, %v1173_v10  ;;  %vm1192_vm11 = vweird.f32 %v1111_v11 }
 0x4f8   :  { %v1199_v1 = vor.u32 1.1754944e-38, %v1198_v61  ;;  %vm1197_vm13 = vcmp.eq.f32.partialorder %v1196_v59, 8.507059e+37 }
 0x4f9   :  { %1205 = vst [vmem:[#allocation7 + $0x18] sm:$0xff] %v1171_v18  ;;  %v1175_v6 = vmul.f32 %v1565_v62, %v1174_v4 }
 0x4fb   :  { %v1176_v8 = vadd.f32 %v1565_v62, %v1175_v6 }
 0x4fc   :  { %v1567_v12 = vpop.eup %1566 }
 0x4fd   :  { %v1180_v14 = vsel %vm1179_vm8, %v1565_v62, %v1176_v8  ;;  %v1188_v16 = vmul.f32 %v1567_v12, %v1111_v11  ;;  %vm1193_vm10 = vweird.f32 %v1567_v12 }
 0x4fe   :  { %v1185_v20 = vsel %vm1182_vm9, %v1184_v13, %v1180_v14  ;;  %vm1194_vm12 = vmor %vm1192_vm11, %vm1193_vm10 }
 0x4ff   :  { %v1186_v0 = vmul.f32 %v1996_v15, %v1185_v20  ;;  %v1189_v34 = vsub.f32 1.0, %v1188_v16 }
 0x501   :  { %1206 = vst [vmem:[#allocation7 + $0x20] sm:$0xff] %v1186_v0  ;;  %v1190_v9 = vmul.f32 %v1567_v12, %v1189_v34 }
 0x503   :  { %v1191_v60 = vadd.f32 %v1567_v12, %v1190_v9 }
 0x505   :  { %v1195_v24 = vsel %vm1194_vm12, %v1567_v12, %v1191_v60 }
 0x506   :  { %v1200_v25 = vsel %vm1197_vm13, %v1199_v1, %v1195_v24 }
 0x507   :  { %v1201_v15 = vmul.f32 %v1999_v19, %v1200_v25 }
 0x509   :  { %1207 = vst [vmem:[#allocation7 + $0x28] sm:$0xff] %v1201_v15 }
 0x50a   :  { %1220 = dma.vmem_to_hbm [thread:$0]  %s1213_s19, 768, %s1215_s22, [#allocation4], %s1647_s25, %s1647_s25, %s1648_s26  }
 0x50b   :  { %1644 = dma.done.wait [#allocation4], 768  }
 0x50c   :  { %1645 = vsyncadd [#allocation4], 4294966528 }
 0x50d   :  { %1225 = vsyncpa [#allocation3], 1 }
 0x50e   :  { %1226 = vsyncpa [#allocation6], 1 }
 0x50f   :  { %1227 = vsyncpa [#allocation4], 1 }

</bundles_post_ra>
